<compile_context>
chip_gen: v7x
topology: tpu7x:2x2x1
jax: 0.10.0
libtpu: 0.0.40
codegen_flags: <defaults>
</compile_context>

<pallas_src>
import jax
import jax.numpy as jnp
from jax import lax
from jax.experimental import pallas as pl
from jax.experimental.pallas import tpu as pltpu


def _fold_bn(gamma, beta, mean, var, eps=1e-5):
    """Fold an eval-mode BatchNorm2d into per-channel (scale, bias)."""
    scale = gamma / jnp.sqrt(var + eps)
    return scale, beta - mean * scale


def _make_depth_wise_kernel(Wh, Mimg):
    """Fused kernel; Mimg = Bt*Hh*Wh rows per stride-2 phase per grid step."""

    def kernel(x_ref, rm_ref, cm_ref, rcm_ref,
               w1_ref, s1_ref, b1_ref, a1_ref,
               wdw_ref, s2_ref, b2_ref, a2_ref,
               w3_ref, s3_ref, b3_ref, o_ref):
        # ---- 1x1 expand conv + folded BN + PReLU over all 4 stride-2 phases ----
        h = jnp.dot(x_ref[...], w1_ref[...],
                    preferred_element_type=jnp.float32)          # (4*Mimg, G)
        h = h * s1_ref[...] + b1_ref[...]
        h = jnp.where(h >= 0.0, h, h * a1_ref[...])

        # stride-2 phase slabs (row parity p, col parity q, phase = 2p+q)
        ph0 = h[0 * Mimg:1 * Mimg, :]    # (even row, even col)
        ph1 = h[1 * Mimg:2 * Mimg, :]    # (even row, odd  col)
        ph2 = h[2 * Mimg:3 * Mimg, :]    # (odd  row, even col)
        ph3 = h[3 * Mimg:4 * Mimg, :]    # (odd  row, odd  col)

        wdw = wdw_ref[...]                                       # (9, G), t = ky*3+kx

        # ---- depthwise 3x3, stride 2, pad 1: phase shift-and-accumulate ----
        # unshifted taps (output (i,j) reads rows {2i, 2i+1}, cols {2j, 2j+1})
        acc = ph0 * wdw[4:5, :]                                  # (ky,kx)=(1,1)
        acc = acc + ph1 * wdw[5:6, :]                            # (1,2)
        acc = acc + ph2 * wdw[7:8, :]                            # (2,1)
        acc = acc + ph3 * wdw[8:9, :]                            # (2,2)

        # column-shifted taps (read half-col j-1): XLU roll + shared col mask
        p1c = pltpu.roll(ph1, shift=1, axis=0)
        p3c = pltpu.roll(ph3, shift=1, axis=0)
        acc = acc + cm_ref[...] * (p1c * wdw[3:4, :]             # (1,0)
                                   + p3c * wdw[6:7, :])          # (2,0)

        # row-shifted taps (read half-row i-1): roll by Wh + shared row mask
        p2r = pltpu.roll(ph2, shift=Wh, axis=0)
        p3r = pltpu.roll(ph3, shift=Wh, axis=0)
        acc = acc + rm_ref[...] * (p2r * wdw[1:2, :]             # (0,1)
                                   + p3r * wdw[2:3, :])          # (0,2)

        # corner tap (row i-1, col j-1): roll the row-rolled slab by 1 more
        p3rc = pltpu.roll(p3r, shift=1, axis=0)
        acc = acc + rcm_ref[...] * (p3rc * wdw[0:1, :])          # (0,0)

        # folded BN + PReLU of the depthwise Conv_block
        acc = acc * s2_ref[...] + b2_ref[...]
        acc = jnp.where(acc >= 0.0, acc, acc * a2_ref[...])

        # ---- 1x1 projection + folded BN (Linear_block, no activation) ----
        out = jnp.dot(acc.astype(w3_ref.dtype), w3_ref[...],
                      preferred_element_type=jnp.float32)
        o_ref[...] = (out * s3_ref[...] + b3_ref[...]).astype(o_ref.dtype)

    return kernel


def _pick_bt(B, HWh, Cin, G, Cout, x_bytes, budget_bytes):
    """Largest batch tile whose per-step footprint fits the VMEM budget, preferring
    nb >= 2 grid steps (software pipelining / v7x two-TensorCore split).  Also
    enforces Bt*Hh*Wh % 8 == 0 (sublane alignment for BlockSpecs and phase slices)."""
    def est(bt):
        m = bt * HWh
        return (2 * 4 * m * Cin * x_bytes     # input (4 phases), double-buffered
                + 2 * m * Cout * 4            # output, double-buffered
                + 6 * m * G * 4               # three masks, double-buffered
                + 12 * m * G * 4)             # h + rolled taps + acc live values
    cands = [bt for bt in range(1, B + 1)
             if B % bt == 0 and (bt * HWh) % 8 == 0 and est(bt) <= budget_bytes]
    if not cands:
        return None
    pref = [bt for bt in cands if B // bt >= 2]
    return max(pref) if pref else max(cands)


def depth_wise_forward(x_nchw, P, *, residual=False,
                       matmul_dtype=jnp.float32,
                       vmem_budget_bytes=24 * 2**20,
                       vmem_limit_bytes=48 * 2**20):
    """Fused TPU forward for Depth_Wise with its default config
    (1x1 conv -> depthwise 3x3, stride 2, pad 1 -> 1x1 conv, eval-mode BN)."""
    # TODO(synk): residual=True (stride=(1,1), in_c==out_c) not implemented here;
    # the module default is residual=False.
    assert not residual, "residual Depth_Wise variant not implemented"

    B, Cin, H, W = x_nchw.shape
    assert H % 2 == 0 and W % 2 == 0, "stride-2 path expects even H, W"
    Hh, Wh = H // 2, W // 2
    HWh = Hh * Wh
    G = P['wdw'].shape[0]                         # groups (depthwise width)
    Cout = P['w3'].shape[0]

    # fold the three eval-mode BatchNorms into per-channel scale / bias
    s1, b1 = _fold_bn(P['bn1_g'], P['bn1_b'], P['bn1_m'], P['bn1_v'])
    s2, b2 = _fold_bn(P['bn2_g'], P['bn2_b'], P['bn2_m'], P['bn2_v'])
    s3, b3 = _fold_bn(P['bn3_g'], P['bn3_b'], P['bn3_m'], P['bn3_v'])

    # conv weights in matmul / per-tap form (channels on the lane axis)
    w1 = P['w1'][:, :, 0, 0].T.astype(matmul_dtype)              # (Cin, G)
    w3 = P['w3'][:, :, 0, 0].T.astype(matmul_dtype)              # (G, Cout)
    wdw = P['wdw'][:, 0].reshape(G, 9).T.astype(jnp.float32)     # (9, G)
    a1 = P['a1'].reshape(1, G).astype(jnp.float32)
    a2 = P['a2'].reshape(1, G).astype(jnp.float32)
    s1 = s1.reshape(1, G).astype(jnp.float32)
    b1 = b1.reshape(1, G).astype(jnp.float32)
    s2 = s2.reshape(1, G).astype(jnp.float32)
    b2 = b2.reshape(1, G).astype(jnp.float32)
    s3 = s3.reshape(1, Cout).astype(jnp.float32)
    b3 = b3.reshape(1, Cout).astype(jnp.float32)

    # VMEM-budget-aware batch tiling
    x_bytes = jnp.dtype(matmul_dtype).itemsize
    Bt = _pick_bt(B, HWh, Cin, G, Cout, x_bytes, vmem_budget_bytes)
    if Bt is None:
        # TODO(synk): add a spatial (row-block) grid axis for very large feature maps
        # / odd Hh*Wh so a sublane-aligned tile always fits the VMEM budget.
        raise NotImplementedError("no aligned batch tile fits the VMEM budget")
    nb = B // Bt
    Mimg = Bt * HWh
    Min = 4 * Mimg

    # boundary masks for the shifted taps (per-row constants, computed once here so
    # the kernel does no div/mod; DMA'd once thanks to constant index_maps)
    ridx = jnp.arange(Mimg, dtype=jnp.int32)
    rmask = (((ridx // Wh) % Hh) >= 1).astype(jnp.float32)       # valid "row i-1"
    cmask = ((ridx % Wh) >= 1).astype(jnp.float32)               # valid "col j-1"
    rmask2 = jnp.broadcast_to(rmask[:, None], (Mimg, G))
    cmask2 = jnp.broadcast_to(cmask[:, None], (Mimg, G))
    rcmask2 = rmask2 * cmask2

    # single relayout pass: NCHW -> rows [block, phase(2p+q), image, i, j], channels last
    # TODO(synk): consume NHWC / phase-major activations directly from the producer to
    # remove this extra HBM pass over x.
    xph = (x_nchw.astype(matmul_dtype)
           .reshape(nb, Bt, Cin, Hh, 2, Wh, 2)
           .transpose(0, 4, 6, 1, 3, 5, 2))                      # (nb,2,2,Bt,Hh,Wh,Cin)
    x_flat = xph.reshape(nb * Min, Cin)

    kernel = _make_depth_wise_kernel(Wh, Mimg)
    const = lambda n: (0, 0)

    # TODO(synk): if the real model has G/Cout < 128, pack row-groups along the lane
    # axis for lane-dense (unmasked) stores / full MXU width.
    grid_spec = pltpu.PrefetchScalarGridSpec(
        num_scalar_prefetch=0,
        grid=(nb,),
        in_specs=[
            pl.BlockSpec((Min, Cin), lambda n: (n, 0)),   # stride-2 phase tokens
            pl.BlockSpec((Mimg, G), const),               # row mask
            pl.BlockSpec((Mimg, G), const),               # col mask
            pl.BlockSpec((Mimg, G), const),               # row*col (corner) mask
            pl.BlockSpec((Cin, G), const),                # 1x1 expand weight
            pl.BlockSpec((1, G), const),                  # bn1 scale
            pl.BlockSpec((1, G), const),                  # bn1 bias
            pl.BlockSpec((1, G), const),                  # prelu1 alpha
            pl.BlockSpec((9, G), const),                  # depthwise 3x3 taps
            pl.BlockSpec((1, G), const),                  # bn2 scale
            pl.BlockSpec((1, G), const),                  # bn2 bias
            pl.BlockSpec((1, G), const),                  # prelu2 alpha
            pl.BlockSpec((G, Cout), const),               # 1x1 project weight
            pl.BlockSpec((1, Cout), const),               # bn3 scale
            pl.BlockSpec((1, Cout), const),               # bn3 bias
        ],
        out_specs=pl.BlockSpec((Mimg, Cout), lambda n: (n, 0)),
    )
    out_flat = pl.pallas_call(
        kernel,
        out_shape=jax.ShapeDtypeStruct((nb * Mimg, Cout), jnp.float32),
        grid_spec=grid_spec,
        compiler_params=pltpu.CompilerParams(
            dimension_semantics=("parallel",),            # batch blocks independent
            vmem_limit_bytes=int(vmem_limit_bytes)),
    )(x_flat, rmask2, cmask2, rcmask2,
      w1, s1, b1, a1, wdw, s2, b2, a2, w3, s3, b3)

    out = out_flat.reshape(B, Hh, Wh, Cout)
    return jnp.transpose(out, (0, 3, 1, 2))               # NCHW, (B, Cout, H/2, W/2)


# ---------------- pure-JAX reference (for verification) ----------------
def ref_depth_wise(x, P):
    eps = 1e-5

    def bn(y, g, b, m, v):
        inv = g / jnp.sqrt(v + eps)
        return ((y - m[None, :, None, None]) * inv[None, :, None, None]
                + b[None, :, None, None])

    def prelu(y, a):
        return jnp.where(y >= 0, y, y * a[None, :, None, None])

    y = jnp.einsum('bihw,oi->bohw', x, P['w1'][:, :, 0, 0])
    y = prelu(bn(y, P['bn1_g'], P['bn1_b'], P['bn1_m'], P['bn1_v']), P['a1'])
    g = y.shape[1]
    y = lax.conv_general_dilated(y, P['wdw'], window_strides=(2, 2),
                                 padding=((1, 1), (1, 1)),
                                 dimension_numbers=('NCHW', 'OIHW', 'NCHW'),
                                 feature_group_count=g)
    y = prelu(bn(y, P['bn2_g'], P['bn2_b'], P['bn2_m'], P['bn2_v']), P['a2'])
    y = jnp.einsum('bihw,oi->bohw', y, P['w3'][:, :, 0, 0])
    y = bn(y, P['bn3_g'], P['bn3_b'], P['bn3_m'], P['bn3_v'])
    return y


if __name__ == "__main__":
    B, Cin, H, W = 2, 32, 16, 16
    G, Cout = 64, 64                      # groups (depthwise width), projection out

    key = jax.random.PRNGKey(0)
    ks = jax.random.split(key, 20)
    P = dict(
        # Conv_block 1: 1x1 conv (in_c -> groups) + BN + PReLU
        w1=0.2 * jax.random.normal(ks[0], (G, Cin, 1, 1), jnp.float32),
        bn1_g=1.0 + 0.1 * jax.random.normal(ks[1], (G,), jnp.float32),
        bn1_b=0.1 * jax.random.normal(ks[2], (G,), jnp.float32),
        bn1_m=0.1 * jax.random.normal(ks[3], (G,), jnp.float32),
        bn1_v=0.5 + jnp.abs(jax.random.normal(ks[4], (G,), jnp.float32)),
        a1=0.25 + 0.05 * jax.random.normal(ks[5], (G,), jnp.float32),
        # Conv_block 2: depthwise 3x3, stride 2, pad 1 + BN + PReLU
        wdw=0.2 * jax.random.normal(ks[6], (G, 1, 3, 3), jnp.float32),
        bn2_g=1.0 + 0.1 * jax.random.normal(ks[7], (G,), jnp.float32),
        bn2_b=0.1 * jax.random.normal(ks[8], (G,), jnp.float32),
        bn2_m=0.1 * jax.random.normal(ks[9], (G,), jnp.float32),
        bn2_v=0.5 + jnp.abs(jax.random.normal(ks[10], (G,), jnp.float32)),
        a2=0.25 + 0.05 * jax.random.normal(ks[11], (G,), jnp.float32),
        # Linear_block: 1x1 conv (groups -> out_c) + BN
        w3=0.2 * jax.random.normal(ks[12], (Cout, G, 1, 1), jnp.float32),
        bn3_g=1.0 + 0.1 * jax.random.normal(ks[13], (Cout,), jnp.float32),
        bn3_b=0.1 * jax.random.normal(ks[14], (Cout,), jnp.float32),
        bn3_m=0.1 * jax.random.normal(ks[15], (Cout,), jnp.float32),
        bn3_v=0.5 + jnp.abs(jax.random.normal(ks[16], (Cout,), jnp.float32)),
    )
    x = jax.random.normal(ks[17], (B, Cin, H, W), jnp.float32)

    out = depth_wise_forward(x, P)
    jax.block_until_ready(out)

    ref = ref_depth_wise(x, P)
    err = float(jnp.max(jnp.abs(out - ref)))
    if out.shape == ref.shape and err < 1e-3:
        print("KERNEL_OK")
    else:
        print(f"MISMATCH shape={out.shape} max_abs_err={err}")
</pallas_src>

<mosaic_0001>
module attributes {stable_mosaic.version = 11 : i64} {
  func.func @kernel(%arg0: i32, %arg1: memref<256x32xf32, #tpu.memory_space<vmem>>, %arg2: memref<64x64xf32, #tpu.memory_space<vmem>>, %arg3: memref<64x64xf32, #tpu.memory_space<vmem>>, %arg4: memref<64x64xf32, #tpu.memory_space<vmem>>, %arg5: memref<32x64xf32, #tpu.memory_space<vmem>>, %arg6: memref<1x64xf32, #tpu.memory_space<vmem>>, %arg7: memref<1x64xf32, #tpu.memory_space<vmem>>, %arg8: memref<1x64xf32, #tpu.memory_space<vmem>>, %arg9: memref<9x64xf32, #tpu.memory_space<vmem>>, %arg10: memref<1x64xf32, #tpu.memory_space<vmem>>, %arg11: memref<1x64xf32, #tpu.memory_space<vmem>>, %arg12: memref<1x64xf32, #tpu.memory_space<vmem>>, %arg13: memref<64x64xf32, #tpu.memory_space<vmem>>, %arg14: memref<1x64xf32, #tpu.memory_space<vmem>>, %arg15: memref<1x64xf32, #tpu.memory_space<vmem>>, %arg16: memref<64x64xf32, #tpu.memory_space<vmem>>) attributes {dimension_semantics = [#tpu.dimension_semantics<parallel>], iteration_bounds = array<i64: 2>, scalar_prefetch = 0 : i64, scratch_operands = 0 : i64, tpu.core_type = #tpu.core_type<tc>, window_params = [{transform_indices = @transform_0, window_bounds = array<i64: 256, 32>}, {pipeline_mode = #tpu.pipeline_mode<synchronous>, transform_indices = @transform_1, window_bounds = array<i64: 64, 64>}, {pipeline_mode = #tpu.pipeline_mode<synchronous>, transform_indices = @transform_2, window_bounds = array<i64: 64, 64>}, {pipeline_mode = #tpu.pipeline_mode<synchronous>, transform_indices = @transform_3, window_bounds = array<i64: 64, 64>}, {pipeline_mode = #tpu.pipeline_mode<synchronous>, transform_indices = @transform_4, window_bounds = array<i64: 32, 64>}, {pipeline_mode = #tpu.pipeline_mode<synchronous>, transform_indices = @transform_5, window_bounds = array<i64: 1, 64>}, {pipeline_mode = #tpu.pipeline_mode<synchronous>, transform_indices = @transform_6, window_bounds = array<i64: 1, 64>}, {pipeline_mode = #tpu.pipeline_mode<synchronous>, transform_indices = @transform_7, window_bounds = array<i64: 1, 64>}, {pipeline_mode = #tpu.pipeline_mode<synchronous>, transform_indices = @transform_8, window_bounds = array<i64: 9, 64>}, {pipeline_mode = #tpu.pipeline_mode<synchronous>, transform_indices = @transform_9, window_bounds = array<i64: 1, 64>}, {pipeline_mode = #tpu.pipeline_mode<synchronous>, transform_indices = @transform_10, window_bounds = array<i64: 1, 64>}, {pipeline_mode = #tpu.pipeline_mode<synchronous>, transform_indices = @transform_11, window_bounds = array<i64: 1, 64>}, {pipeline_mode = #tpu.pipeline_mode<synchronous>, transform_indices = @transform_12, window_bounds = array<i64: 64, 64>}, {pipeline_mode = #tpu.pipeline_mode<synchronous>, transform_indices = @transform_13, window_bounds = array<i64: 1, 64>}, {pipeline_mode = #tpu.pipeline_mode<synchronous>, transform_indices = @transform_14, window_bounds = array<i64: 1, 64>}, {transform_indices = @transform_15, window_bounds = array<i64: 64, 64>}]} {
    %c0 = arith.constant 0 : index
    %c0_0 = arith.constant 0 : index
    %0 = vector.load %arg1[%c0, %c0_0] : memref<256x32xf32, #tpu.memory_space<vmem>>, vector<256x32xf32>
    %c0_1 = arith.constant 0 : index
    %c0_2 = arith.constant 0 : index
    %1 = vector.load %arg5[%c0_1, %c0_2] : memref<32x64xf32, #tpu.memory_space<vmem>>, vector<32x64xf32>
    %cst = arith.constant dense<0.000000e+00> : vector<256x64xf32>
    %2 = tpu.matmul %0, %1, %cst {dimension_numbers = #tpu.dot_dimension_numbers<[1], [0], [0], [1], [0, 0, 1, 1], [], []>} : vector<256x32xf32>, vector<32x64xf32>, vector<256x64xf32> -> vector<256x64xf32>
    %c0_3 = arith.constant 0 : index
    %c0_4 = arith.constant 0 : index
    %3 = vector.load %arg6[%c0_3, %c0_4] : memref<1x64xf32, #tpu.memory_space<vmem>>, vector<1x64xf32>
    %4 = vector.broadcast %3 : vector<1x64xf32> to vector<256x64xf32>
    %5 = arith.mulf %2, %4 : vector<256x64xf32>
    %c0_5 = arith.constant 0 : index
    %c0_6 = arith.constant 0 : index
    %6 = vector.load %arg7[%c0_5, %c0_6] : memref<1x64xf32, #tpu.memory_space<vmem>>, vector<1x64xf32>
    %7 = vector.broadcast %6 : vector<1x64xf32> to vector<256x64xf32>
    %8 = arith.addf %5, %7 : vector<256x64xf32>
    %cst_7 = arith.constant 0.000000e+00 : f32
    %9 = vector.broadcast %cst_7 : f32 to vector<256x64xf32>
    %10 = arith.cmpf oge, %8, %9 : vector<256x64xf32>
    %c0_8 = arith.constant 0 : index
    %c0_9 = arith.constant 0 : index
    %11 = vector.load %arg8[%c0_8, %c0_9] : memref<1x64xf32, #tpu.memory_space<vmem>>, vector<1x64xf32>
    %12 = vector.broadcast %11 : vector<1x64xf32> to vector<256x64xf32>
    %13 = arith.mulf %8, %12 : vector<256x64xf32>
    %14 = arith.select %10, %8, %13 : vector<256x64xi1>, vector<256x64xf32>
    %15 = vector.extract_strided_slice %14 {offsets = [0, 0], sizes = [64, 64], strides = [1, 1]} : vector<256x64xf32> to vector<64x64xf32>
    %16 = vector.extract_strided_slice %14 {offsets = [64, 0], sizes = [64, 64], strides = [1, 1]} : vector<256x64xf32> to vector<64x64xf32>
    %17 = vector.extract_strided_slice %14 {offsets = [128, 0], sizes = [64, 64], strides = [1, 1]} : vector<256x64xf32> to vector<64x64xf32>
    %18 = vector.extract_strided_slice %14 {offsets = [192, 0], sizes = [64, 64], strides = [1, 1]} : vector<256x64xf32> to vector<64x64xf32>
    %c0_10 = arith.constant 0 : index
    %c0_11 = arith.constant 0 : index
    %19 = vector.load %arg9[%c0_10, %c0_11] : memref<9x64xf32, #tpu.memory_space<vmem>>, vector<9x64xf32>
    %20 = vector.extract_strided_slice %19 {offsets = [4, 0], sizes = [1, 64], strides = [1, 1]} : vector<9x64xf32> to vector<1x64xf32>
    %21 = vector.broadcast %20 : vector<1x64xf32> to vector<64x64xf32>
    %22 = arith.mulf %15, %21 : vector<64x64xf32>
    %23 = vector.extract_strided_slice %19 {offsets = [5, 0], sizes = [1, 64], strides = [1, 1]} : vector<9x64xf32> to vector<1x64xf32>
    %24 = vector.broadcast %23 : vector<1x64xf32> to vector<64x64xf32>
    %25 = arith.mulf %16, %24 : vector<64x64xf32>
    %26 = arith.addf %22, %25 : vector<64x64xf32>
    %27 = vector.extract_strided_slice %19 {offsets = [7, 0], sizes = [1, 64], strides = [1, 1]} : vector<9x64xf32> to vector<1x64xf32>
    %28 = vector.broadcast %27 : vector<1x64xf32> to vector<64x64xf32>
    %29 = arith.mulf %17, %28 : vector<64x64xf32>
    %30 = arith.addf %26, %29 : vector<64x64xf32>
    %31 = vector.extract_strided_slice %19 {offsets = [8, 0], sizes = [1, 64], strides = [1, 1]} : vector<9x64xf32> to vector<1x64xf32>
    %32 = vector.broadcast %31 : vector<1x64xf32> to vector<64x64xf32>
    %33 = arith.mulf %18, %32 : vector<64x64xf32>
    %34 = arith.addf %30, %33 : vector<64x64xf32>
    %c1_i32 = arith.constant 1 : i32
    %35 = tpu.dynamic_rotate %16 by %c1_i32 dim 0 : vector<64x64xf32>, i32 -> vector<64x64xf32>
    %c1_i32_12 = arith.constant 1 : i32
    %36 = tpu.dynamic_rotate %18 by %c1_i32_12 dim 0 : vector<64x64xf32>, i32 -> vector<64x64xf32>
    %c0_13 = arith.constant 0 : index
    %c0_14 = arith.constant 0 : index
    %37 = vector.load %arg3[%c0_13, %c0_14] : memref<64x64xf32, #tpu.memory_space<vmem>>, vector<64x64xf32>
    %38 = vector.extract_strided_slice %19 {offsets = [3, 0], sizes = [1, 64], strides = [1, 1]} : vector<9x64xf32> to vector<1x64xf32>
    %39 = vector.broadcast %38 : vector<1x64xf32> to vector<64x64xf32>
    %40 = arith.mulf %35, %39 : vector<64x64xf32>
    %41 = vector.extract_strided_slice %19 {offsets = [6, 0], sizes = [1, 64], strides = [1, 1]} : vector<9x64xf32> to vector<1x64xf32>
    %42 = vector.broadcast %41 : vector<1x64xf32> to vector<64x64xf32>
    %43 = arith.mulf %36, %42 : vector<64x64xf32>
    %44 = arith.addf %40, %43 : vector<64x64xf32>
    %45 = arith.mulf %37, %44 : vector<64x64xf32>
    %46 = arith.addf %34, %45 : vector<64x64xf32>
    %c8_i32 = arith.constant 8 : i32
    %47 = tpu.dynamic_rotate %17 by %c8_i32 dim 0 : vector<64x64xf32>, i32 -> vector<64x64xf32>
    %c8_i32_15 = arith.constant 8 : i32
    %48 = tpu.dynamic_rotate %18 by %c8_i32_15 dim 0 : vector<64x64xf32>, i32 -> vector<64x64xf32>
    %c0_16 = arith.constant 0 : index
    %c0_17 = arith.constant 0 : index
    %49 = vector.load %arg2[%c0_16, %c0_17] : memref<64x64xf32, #tpu.memory_space<vmem>>, vector<64x64xf32>
    %50 = vector.extract_strided_slice %19 {offsets = [1, 0], sizes = [1, 64], strides = [1, 1]} : vector<9x64xf32> to vector<1x64xf32>
    %51 = vector.broadcast %50 : vector<1x64xf32> to vector<64x64xf32>
    %52 = arith.mulf %47, %51 : vector<64x64xf32>
    %53 = vector.extract_strided_slice %19 {offsets = [2, 0], sizes = [1, 64], strides = [1, 1]} : vector<9x64xf32> to vector<1x64xf32>
    %54 = vector.broadcast %53 : vector<1x64xf32> to vector<64x64xf32>
    %55 = arith.mulf %48, %54 : vector<64x64xf32>
    %56 = arith.addf %52, %55 : vector<64x64xf32>
    %57 = arith.mulf %49, %56 : vector<64x64xf32>
    %58 = arith.addf %46, %57 : vector<64x64xf32>
    %c1_i32_18 = arith.constant 1 : i32
    %59 = tpu.dynamic_rotate %48 by %c1_i32_18 dim 0 : vector<64x64xf32>, i32 -> vector<64x64xf32>
    %c0_19 = arith.constant 0 : index
    %c0_20 = arith.constant 0 : index
    %60 = vector.load %arg4[%c0_19, %c0_20] : memref<64x64xf32, #tpu.memory_space<vmem>>, vector<64x64xf32>
    %61 = vector.extract_strided_slice %19 {offsets = [0, 0], sizes = [1, 64], strides = [1, 1]} : vector<9x64xf32> to vector<1x64xf32>
    %62 = vector.broadcast %61 : vector<1x64xf32> to vector<64x64xf32>
    %63 = arith.mulf %59, %62 : vector<64x64xf32>
    %64 = arith.mulf %60, %63 : vector<64x64xf32>
    %65 = arith.addf %58, %64 : vector<64x64xf32>
    %c0_21 = arith.constant 0 : index
    %c0_22 = arith.constant 0 : index
    %66 = vector.load %arg10[%c0_21, %c0_22] : memref<1x64xf32, #tpu.memory_space<vmem>>, vector<1x64xf32>
    %67 = vector.broadcast %66 : vector<1x64xf32> to vector<64x64xf32>
    %68 = arith.mulf %65, %67 : vector<64x64xf32>
    %c0_23 = arith.constant 0 : index
    %c0_24 = arith.constant 0 : index
    %69 = vector.load %arg11[%c0_23, %c0_24] : memref<1x64xf32, #tpu.memory_space<vmem>>, vector<1x64xf32>
    %70 = vector.broadcast %69 : vector<1x64xf32> to vector<64x64xf32>
    %71 = arith.addf %68, %70 : vector<64x64xf32>
    %cst_25 = arith.constant 0.000000e+00 : f32
    %72 = vector.broadcast %cst_25 : f32 to vector<64x64xf32>
    %73 = arith.cmpf oge, %71, %72 : vector<64x64xf32>
    %c0_26 = arith.constant 0 : index
    %c0_27 = arith.constant 0 : index
    %74 = vector.load %arg12[%c0_26, %c0_27] : memref<1x64xf32, #tpu.memory_space<vmem>>, vector<1x64xf32>
    %75 = vector.broadcast %74 : vector<1x64xf32> to vector<64x64xf32>
    %76 = arith.mulf %71, %75 : vector<64x64xf32>
    %77 = arith.select %73, %71, %76 : vector<64x64xi1>, vector<64x64xf32>
    %c0_28 = arith.constant 0 : index
    %c0_29 = arith.constant 0 : index
    %78 = vector.load %arg13[%c0_28, %c0_29] : memref<64x64xf32, #tpu.memory_space<vmem>>, vector<64x64xf32>
    %cst_30 = arith.constant dense<0.000000e+00> : vector<64x64xf32>
    %79 = tpu.matmul %77, %78, %cst_30 {dimension_numbers = #tpu.dot_dimension_numbers<[1], [0], [0], [1], [0, 0, 1, 1], [], []>} : vector<64x64xf32>, vector<64x64xf32>, vector<64x64xf32> -> vector<64x64xf32>
    %c0_31 = arith.constant 0 : index
    %c0_32 = arith.constant 0 : index
    %80 = vector.load %arg14[%c0_31, %c0_32] : memref<1x64xf32, #tpu.memory_space<vmem>>, vector<1x64xf32>
    %81 = vector.broadcast %80 : vector<1x64xf32> to vector<64x64xf32>
    %82 = arith.mulf %79, %81 : vector<64x64xf32>
    %c0_33 = arith.constant 0 : index
    %c0_34 = arith.constant 0 : index
    %83 = vector.load %arg15[%c0_33, %c0_34] : memref<1x64xf32, #tpu.memory_space<vmem>>, vector<1x64xf32>
    %84 = vector.broadcast %83 : vector<1x64xf32> to vector<64x64xf32>
    %85 = arith.addf %82, %84 : vector<64x64xf32>
    %c0_35 = arith.constant 0 : index
    %c0_36 = arith.constant 0 : index
    %86 = vector.load %arg16[%c0_35, %c0_36] : memref<64x64xf32, #tpu.memory_space<vmem>>, vector<64x64xf32>
    tpu.vector_store %arg16[%c0_35, %c0_36], %85 {strides = array<i32>} : memref<64x64xf32, #tpu.memory_space<vmem>>, vector<64x64xf32>,
    return
  }
  func.func @transform_0(%arg0: i32) -> (i32, i32) {
    %c0_i32 = arith.constant 0 : i32
    %c0_i32_0 = arith.constant 0 : i32
    return %arg0, %c0_i32 : i32, i32
  }
  func.func @transform_1(%arg0: i32) -> (i32, i32) {
    %c0_i32 = arith.constant 0 : i32
    %c0_i32_0 = arith.constant 0 : i32
    %c0_i32_1 = arith.constant 0 : i32
    return %c0_i32, %c0_i32_0 : i32, i32
  }
  func.func @transform_2(%arg0: i32) -> (i32, i32) {
    %c0_i32 = arith.constant 0 : i32
    %c0_i32_0 = arith.constant 0 : i32
    %c0_i32_1 = arith.constant 0 : i32
    return %c0_i32, %c0_i32_0 : i32, i32
  }
  func.func @transform_3(%arg0: i32) -> (i32, i32) {
    %c0_i32 = arith.constant 0 : i32
    %c0_i32_0 = arith.constant 0 : i32
    %c0_i32_1 = arith.constant 0 : i32
    return %c0_i32, %c0_i32_0 : i32, i32
  }
  func.func @transform_4(%arg0: i32) -> (i32, i32) {
    %c0_i32 = arith.constant 0 : i32
    %c0_i32_0 = arith.constant 0 : i32
    %c0_i32_1 = arith.constant 0 : i32
    return %c0_i32, %c0_i32_0 : i32, i32
  }
  func.func @transform_5(%arg0: i32) -> (i32, i32) {
    %c0_i32 = arith.constant 0 : i32
    %c0_i32_0 = arith.constant 0 : i32
    %c0_i32_1 = arith.constant 0 : i32
    return %c0_i32, %c0_i32_0 : i32, i32
  }
  func.func @transform_6(%arg0: i32) -> (i32, i32) {
    %c0_i32 = arith.constant 0 : i32
    %c0_i32_0 = arith.constant 0 : i32
    %c0_i32_1 = arith.constant 0 : i32
    return %c0_i32, %c0_i32_0 : i32, i32
  }
  func.func @transform_7(%arg0: i32) -> (i32, i32) {
    %c0_i32 = arith.constant 0 : i32
    %c0_i32_0 = arith.constant 0 : i32
    %c0_i32_1 = arith.constant 0 : i32
    return %c0_i32, %c0_i32_0 : i32, i32
  }
  func.func @transform_8(%arg0: i32) -> (i32, i32) {
    %c0_i32 = arith.constant 0 : i32
    %c0_i32_0 = arith.constant 0 : i32
    %c0_i32_1 = arith.constant 0 : i32
    return %c0_i32, %c0_i32_0 : i32, i32
  }
  func.func @transform_9(%arg0: i32) -> (i32, i32) {
    %c0_i32 = arith.constant 0 : i32
    %c0_i32_0 = arith.constant 0 : i32
    %c0_i32_1 = arith.constant 0 : i32
    return %c0_i32, %c0_i32_0 : i32, i32
  }
  func.func @transform_10(%arg0: i32) -> (i32, i32) {
    %c0_i32 = arith.constant 0 : i32
    %c0_i32_0 = arith.constant 0 : i32
    %c0_i32_1 = arith.constant 0 : i32
    return %c0_i32, %c0_i32_0 : i32, i32
  }
  func.func @transform_11(%arg0: i32) -> (i32, i32) {
    %c0_i32 = arith.constant 0 : i32
    %c0_i32_0 = arith.constant 0 : i32
    %c0_i32_1 = arith.constant 0 : i32
    return %c0_i32, %c0_i32_0 : i32, i32
  }
  func.func @transform_12(%arg0: i32) -> (i32, i32) {
    %c0_i32 = arith.constant 0 : i32
    %c0_i32_0 = arith.constant 0 : i32
    %c0_i32_1 = arith.constant 0 : i32
    return %c0_i32, %c0_i32_0 : i32, i32
  }
  func.func @transform_13(%arg0: i32) -> (i32, i32) {
    %c0_i32 = arith.constant 0 : i32
    %c0_i32_0 = arith.constant 0 : i32
    %c0_i32_1 = arith.constant 0 : i32
    return %c0_i32, %c0_i32_0 : i32, i32
  }
  func.func @transform_14(%arg0: i32) -> (i32, i32) {
    %c0_i32 = arith.constant 0 : i32
    %c0_i32_0 = arith.constant 0 : i32
    %c0_i32_1 = arith.constant 0 : i32
    return %c0_i32, %c0_i32_0 : i32, i32
  }
  func.func @transform_15(%arg0: i32) -> (i32, i32) {
    %c0_i32 = arith.constant 0 : i32
    %c0_i32_0 = arith.constant 0 : i32
    return %arg0, %c0_i32 : i32, i32
  }
}

</mosaic_0001>

<bundles_post_ra>
// kernel: tpu_custom_call.1
= control target key start
LH: loop header
LB: loop body
LE: loop exit
PB: predicated region body
PF: predicated region fallthrough
CT: control target
= control target key end

     0   :  { %s1907_s18 = smov 0   ;;  %s2648_s0 = inlined_call_operand.vmem [shape: f32[512,32], index: 0, kind: input, shape index: {}]   ;;  %s2649_s1 = inlined_call_operand.vmem [shape: f32[64,64], index: 1, kind: input, shape index: {}]   ;;  %s2650_s2 = inlined_call_operand.vmem [shape: f32[64,64], index: 2, kind: input, shape index: {}]   ;;  %s2651_s3 = inlined_call_operand.vmem [shape: f32[64,64], index: 3, kind: input, shape index: {}]   ;;  %s2652_s4 = inlined_call_operand.vmem [shape: f32[32,64], index: 4, kind: input, shape index: {}]   ;;  %s2653_s5 = inlined_call_operand.vmem [shape: f32[1,64], index: 5, kind: input, shape index: {}]   ;;  %s2654_s6 = inlined_call_operand.vmem [shape: f32[1,64], index: 6, kind: input, shape index: {}]   ;;  %s2655_s7 = inlined_call_operand.vmem [shape: f32[1,64], index: 7, kind: input, shape index: {}]   ;;  %s2656_s8 = inlined_call_operand.vmem [shape: f32[9,64], index: 8, kind: input, shape index: {}]   ;;  %s2657_s9 = inlined_call_operand.vmem [shape: f32[1,64], index: 9, kind: input, shape index: {}]   ;;  %s2658_s10 = inlined_call_operand.vmem [shape: f32[1,64], index: 10, kind: input, shape index: {}]   ;;  %s2659_s11 = inlined_call_operand.vmem [shape: f32[1,64], index: 11, kind: input, shape index: {}]   ;;  %s2660_s12 = inlined_call_operand.vmem [shape: f32[64,64], index: 12, kind: input, shape index: {}]   ;;  %s2661_s13 = inlined_call_operand.vmem [shape: f32[1,64], index: 13, kind: input, shape index: {}]   ;;  %s2662_s14 = inlined_call_operand.vmem [shape: f32[1,64], index: 14, kind: input, shape index: {}]   ;;  %s2663_s15 = inlined_call_operand.vmem [shape: f32[128,64], index: 15, kind: output, shape index: {}]  }
   0x1 LB: > { %s1587_s19 = sadd.s32 4294967295, %s1825_s18   ;;  %p1591_p0 = scmp.ge.s32.totalorder %s1825_s18, 1  ;;  %s1825_s18 = sphi %s1907_s18, %s25_s18  }
   0x2   : > { %p438_p1 = scmp.lt.s32.totalorder %s1825_s18, 3 }
   0x4   : > { %p439_p2 = pnand %p1591_p0, %p438_p1 }
   0x6   : > { %442 = sbr.rel (%p439_p2) target bundleno = 566 (0x236), region = 80 }
   0xd   : > { %v530_v0 = vld [vmem:[%s2652_s4] sm:$0xff]  ;;  %v531_v1 = vld [vmem:[%s2652_s4 + $0x8] sm:$0xff]  ;;  %v532_v2 = vld [vmem:[%s2652_s4 + $0x10] sm:$0xff]  ;;  %s1592_s26 = sshll.u32 %s1587_s19, 5  ;;  %vm534_vm0 = vcmask 261120   ;;  %v1039_v50 = vlaneseq  ;;  %s1594_s22 = sshll.u32 %s1587_s19, 3 }
   0xe   : > { %v1783_v3 = vpack.c.bf16 %v531_v1, %v530_v0  ;;  %v533_v4 = vld [vmem:[%s2652_s4 + $0x18] sm:$0xff]  ;;  %p487_p3 = scmp.lt.s32.totalorder %s1592_s26, 63  ;;  %v1355_v38 = vld [vmem:[%s2660_s12] sm:$0xff]  ;;  %v1356_v39 = vld [vmem:[%s2660_s12 + $0x8] sm:$0xff]  ;;  %p493_p4 = scmp.lt.s32.totalorder %s1594_s22, 15 }
   0xf   : > { %v1787_v5 = vpack.c.bf16 %v533_v4, %v532_v2  ;;  %v1791_v40 = vpack.c.bf16 %v1356_v39, %v1355_v38  ;;  %v1357_v41 = vld [vmem:[%s2660_s12 + $0x10] sm:$0xff]  ;;  %v1358_v42 = vld [vmem:[%s2660_s12 + $0x18] sm:$0xff]  ;;  %v1359_v44 = vld [vmem:[%s2660_s12 + $0x20] sm:$0xff]  ;;  %v2022_v51 = vshrl.u32 %v1039_v50, 7 }
  0x10   : > { %1784 = vmatprep.subr.bf16.mxu0 %v1783_v3  ;;  %1807 = vmatprep.subr.bf16.mxu1 %v1783_v3  ;;  %s2705_s26 = smov (!%p487_p3, %s1592_s26), 63  ;;  %v1795_v43 = vpack.c.bf16 %v1358_v42, %v1357_v41  ;;  %v1360_v45 = vld [vmem:[%s2660_s12 + $0x28] sm:$0xff]  ;;  %v1361_v47 = vld [vmem:[%s2660_s12 + $0x30] sm:$0xff]  ;;  %v1362_v48 = vld [vmem:[%s2660_s12 + $0x38] sm:$0xff]  ;;  %s2707_s22 = smov (!%p493_p4, %s1594_s22), 15 }
  0x11   : > { %1786 = vmatpush3.bf16.msra.mxu0 %v1783_v3  ;;  %1809 = vmatpush3.bf16.msra.mxu1 %v1783_v3  ;;  %s1593_s29 = sshll.u32 %s2705_s26, 3  ;;  %v1799_v46 = vpack.c.bf16 %v1360_v45, %v1359_v44  ;;  %v1803_v49 = vpack.c.bf16 %v1362_v48, %v1361_v47  ;;  %v1041_v52 = vsub.s32 4, %v2022_v51  ;;  %v1073_v53 = vsub.s32 7, %v2022_v51  ;;  %v2029_v54 = vld [vmem:[%s2653_s5] ss:$0 sm:$0xff]  ;;  %s1595_s25 = sshll.u32 %s2707_s22, 3 }
  0x12   : > { %1788 = vmatprep.subr.bf16.mxu0 %v1787_v5  ;;  %1808 = vmatprep.subr.bf16.mxu1 %v1787_v5  ;;  %s1932_s17 = scalar_lea.vmem %s2648_s0, %s1593_s29  ;;  %v1037_v55 = vld [vmem:[%s2656_s8] sm:$0xff]  ;;  %v1212_v56 = vsub.s32 1, %v2022_v51  ;;  %v1224_v60 = vsub.s32 2, %v2022_v51  ;;  %vm1121_vm11 = vcmp.lt.s32.totalorder %v2022_v51, 1  ;;  %s496_s30 = scalar_lea.vmem %s2663_s15, %s1595_s25 }
  0x13   : > { %v498_v6 = vld [vmem:[%s1932_s17] sm:$0xff]  ;;  %v499_v8 = vld [vmem:[%s1932_s17 + $0x8] sm:$0xff]  ;;  %v500_v10 = vld [vmem:[%s1932_s17 + $0x10] sm:$0xff]  ;;  %v2042_v62 = vrot.slane %v1037_v55, %v1041_v52  ;;  %v2045_v1 = vrot.slane %v1037_v55, %v1073_v53 }
  0x14   : > { %v518_v7 = vld [vmem:[%s1932_s17 + $0xa0] sm:$0xff]  ;;  %v519_v9 = vld [vmem:[%s1932_s17 + $0xa8] sm:$0xff]  ;;  %1707 = vmatprep.mubr.msk.f32.mxu0 %vm534_vm0, %v498_v6  ;;  %v520_v11 = vld [vmem:[%s1932_s17 + $0xb0] sm:$0xff] }
  0x15   : > { %1790 = vmatpush3.bf16.msra.mxu0 %v1787_v5  ;;  %1810 = vmatpush3.bf16.msra.mxu1 %v1787_v5  ;;  %v501_v12 = vld [vmem:[%s1932_s17 + $0x18] sm:$0xff]  ;;  %v502_v14 = vld [vmem:[%s1932_s17 + $0x20] sm:$0xff]  ;;  %v503_v16 = vld [vmem:[%s1932_s17 + $0x28] sm:$0xff]  ;;  %v2053_v5 = vrot.slane %v1037_v55, %v1212_v56 }
  0x16   : > { %1737 = vmatprep.mubr.msk.f32.mxu1 %vm534_vm0, %v518_v7  ;;  %v521_v13 = vld [vmem:[%s1932_s17 + $0xb8] sm:$0xff]  ;;  %v522_v15 = vld [vmem:[%s1932_s17 + $0xc0] sm:$0xff]  ;;  %v523_v17 = vld [vmem:[%s1932_s17 + $0xc8] sm:$0xff]  ;;  %1792 = vmatprep.subr.bf16.mxu1 %v1791_v40  ;;  %v1168_v7 = vsub.s32 6, %v2022_v51 }
  0x17   : > { %v504_v18 = vld [vmem:[%s1932_s17 + $0x30] sm:$0xff]  ;;  %v505_v20 = vld [vmem:[%s1932_s17 + $0x38] sm:$0xff]  ;;  %v506_v22 = vld [vmem:[%s1932_s17 + $0x40] sm:$0xff] }
  0x18   : > { %1708 = vmatmul.mubr.msk.f32.vlgmr.msra.gmra.mrb[0].mxu0 %vm534_vm0, %v499_v8  ;;  %1738 = vmatmul.mubr.msk.f32.vlgmr.msra.gmra.mrb[0].mxu1 %vm534_vm0, %v519_v9  ;;  %v524_v19 = vld [vmem:[%s1932_s17 + $0xd0] sm:$0xff]  ;;  %v525_v21 = vld [vmem:[%s1932_s17 + $0xd8] sm:$0xff]  ;;  %v526_v23 = vld [vmem:[%s1932_s17 + $0xe0] sm:$0xff] }
  0x19   : > { %1710 = vmatprep.mubr.msk.f32.mxu0 %vm534_vm0, %v500_v10  ;;  %1740 = vmatprep.mubr.msk.f32.mxu1 %vm534_vm0, %v520_v11  ;;  %v507_v24 = vld [vmem:[%s1932_s17 + $0x48] sm:$0xff]  ;;  %v508_v26 = vld [vmem:[%s1932_s17 + $0x50] sm:$0xff]  ;;  %v509_v28 = vld [vmem:[%s1932_s17 + $0x58] sm:$0xff]  ;;  %v1268_v10 = vsub.s32 0, %v2022_v51  ;;  %v1053_v11 = vsub.s32 5, %v2022_v51 }
  0x1a   : > { %v527_v25 = vld [vmem:[%s1932_s17 + $0xe8] sm:$0xff]  ;;  %v528_v27 = vld [vmem:[%s1932_s17 + $0xf0] sm:$0xff]  ;;  %v529_v29 = vld [vmem:[%s1932_s17 + $0xf8] sm:$0xff]  ;;  %1794 = vmatpush3.bf16.msra.mxu1 %v1791_v40 }
  0x1b   : > { %v510_v30 = vld [vmem:[%s1932_s17 + $0x60] sm:$0xff]  ;;  %v511_v31 = vld [vmem:[%s1932_s17 + $0x68] sm:$0xff]  ;;  %v512_v32 = vld [vmem:[%s1932_s17 + $0x70] sm:$0xff]  ;;  %1796 = vmatprep.subr.bf16.mxu1 %v1795_v43 }
  0x1c   : > { %1711 = vmatmul.mubr.msk.f32.gmra.mrb[2].mxu0 %vm534_vm0, %v501_v12  ;;  %1741 = vmatmul.mubr.msk.f32.gmra.mrb[2].mxu1 %vm534_vm0, %v521_v13  ;;  %v513_v33 = vld [vmem:[%s1932_s17 + $0x78] sm:$0xff]  ;;  %v514_v34 = vld [vmem:[%s1932_s17 + $0x80] sm:$0xff]  ;;  %v515_v35 = vld [vmem:[%s1932_s17 + $0x88] sm:$0xff] }
  0x1d   : > { %1713 = vmatprep.mubr.msk.f32.mxu0 %vm534_vm0, %v502_v14  ;;  %1743 = vmatprep.mubr.msk.f32.mxu1 %vm534_vm0, %v522_v15  ;;  %v516_v36 = vld [vmem:[%s1932_s17 + $0x90] sm:$0xff]  ;;  %v517_v37 = vld [vmem:[%s1932_s17 + $0x98] sm:$0xff]  ;;  %v2038_v58 = vld [vmem:[%s2654_s6] ss:$0 sm:$0xff] }
  0x1e   : > { %1798 = vmatpush3.bf16.msra.mxu1 %v1795_v43  ;;  %v2050_v3 = vld [vmem:[%s2655_s7] ss:$0 sm:$0xff] }
  0x1f   : > { %1800 = vmatprep.subr.bf16.mxu1 %v1799_v46 }
  0x20   : > { %1714 = vmatmul.mubr.msk.f32.gmra.mrb[4].mxu0 %vm534_vm0, %v503_v16  ;;  %1744 = vmatmul.mubr.msk.f32.gmra.mrb[4].mxu1 %vm534_vm0, %v523_v17  ;;  %v2063_v16 = vrot.slane %v1037_v55, %v1224_v60  ;;  %v1156_v17 = vsub.s32 3, %v2022_v51 }
  0x21   : > { %1716 = vmatprep.mubr.msk.f32.mxu0 %vm534_vm0, %v504_v18  ;;  %1746 = vmatprep.mubr.msk.f32.mxu1 %vm534_vm0, %v524_v19 }
  0x22   : > { %1802 = vmatpush3.bf16.msra.mxu1 %v1799_v46 }
  0x23   : > { %1804 = vmatprep.subr.bf16.mxu1 %v1803_v49 }
  0x24   : > { %1717 = vmatmul.mubr.msk.f32.gmra.mrb[6].mxu0 %vm534_vm0, %v505_v20  ;;  %1747 = vmatmul.mubr.msk.f32.gmra.mrb[6].mxu1 %vm534_vm0, %v525_v21 }
  0x25   : > { %1719 = vmatprep.mubr.msk.f32.mxu0 %vm534_vm0, %v506_v22  ;;  %1749 = vmatprep.mubr.msk.f32.mxu1 %vm534_vm0, %v526_v23 }
  0x26   : > { %1806 = vmatpush3.bf16.msra.mxu1 %v1803_v49 }
  0x28   : > { %1720 = vmatmul.mubr.msk.f32.gmra.mrb[8].mxu0 %vm534_vm0, %v507_v24  ;;  %1750 = vmatmul.mubr.msk.f32.gmra.mrb[8].mxu1 %vm534_vm0, %v527_v25 }
  0x29   : > { %1722 = vmatprep.mubr.msk.f32.mxu0 %vm534_vm0, %v508_v26  ;;  %1752 = vmatprep.mubr.msk.f32.mxu1 %vm534_vm0, %v528_v27  ;;  %v2072_v26 = vrot.slane %v1037_v55, %v1168_v7  ;;  %v2074_v27 = vrot.slane %v1037_v55, %v1268_v10 }
  0x2c   : > { %1723 = vmatmul.mubr.msk.f32.gmra.mrb[10].mxu0 %vm534_vm0, %v509_v28  ;;  %1753 = vmatmul.mubr.msk.f32.gmra.mrb[10].mxu1 %vm534_vm0, %v529_v29  ;;  %v2076_v28 = vrot.slane %v1037_v55, %v1053_v11 }
  0x2d   : > { %1725 = vmatprep.mubr.msk.f32.mxu0 %vm534_vm0, %v510_v30 }
  0x30   : > { %1726 = vmatmul.mubr.msk.f32.gmra.mrb[12].mxu0 %vm534_vm0, %v511_v31 }
  0x31   : > { %1728 = vmatprep.mubr.msk.f32.mxu0 %vm534_vm0, %v512_v32 }
  0x34   : > { %1729 = vmatmul.mubr.msk.f32.gmra.mrb[14].mxu0 %vm534_vm0, %v513_v33 }
  0x35   : > { %1731 = vmatprep.mubr.msk.f32.mxu0 %vm534_vm0, %v514_v34  ;;  %v2079_v34 = vrot.slane %v1037_v55, %v1156_v17 }
  0x38   : > { %1732 = vmatmul.mubr.msk.f32.gmra.mrb[16].mxu0 %vm534_vm0, %v515_v35 }
  0x39   : > { %1734 = vmatprep.mubr.msk.f32.mxu0 %vm534_vm0, %v516_v36 }
  0x3c   : > { %1735 = vmatmul.mubr.msk.f32.gmra.mrb[18].mxu0 %vm534_vm0, %v517_v37 }
  0xeb   : > { %v1709_v57 = vpop.f32.mrb[0].mxu0  ;;  %v1739_v59 = vpop.f32.mrb[0].mxu1 }
  0xec   : > { %v864_v61 = vmul.f32 %v1709_v57, %v2029_v54  ;;  %v697_v63 = vpop.f32.mrb[1].mxu0  ;;  %v884_v0 = vmul.f32 %v1739_v59, %v2029_v54  ;;  %v797_v2 = vpop.f32.mrb[1].mxu1 }
  0xed   : > { %v863_v4 = vmul.f32 %v2029_v54, %v697_v63  ;;  %v883_v6 = vmul.f32 %v2029_v54, %v797_v2 }
  0xee   : > { %v903_v8 = vadd.f32 %v2038_v58, %v864_v61  ;;  %v923_v9 = vadd.f32 %v2038_v58, %v884_v0 }
  0xef   : > { %v902_v12 = vadd.f32 %v2038_v58, %v863_v4  ;;  %v1712_v13 = vpop.f32.mrb[2].mxu0  ;;  %v922_v14 = vadd.f32 %v2038_v58, %v883_v6  ;;  %v1742_v15 = vpop.f32.mrb[2].mxu1 }
  0xf0   : > { %vm935_vm1 = vcmp.ge.f32.partialorder %v903_v8, 0.0  ;;  %v974_v18 = vmul.f32 %v2050_v3, %v903_v8  ;;  %v866_v19 = vmul.f32 %v1712_v13, %v2029_v54  ;;  %v707_v20 = vpop.f32.mrb[3].mxu0  ;;  %vm955_vm2 = vcmp.ge.f32.partialorder %v923_v9, 0.0  ;;  %v807_v21 = vpop.f32.mrb[3].mxu1 }
  0xf1   : > { %vm934_vm3 = vcmp.ge.f32.partialorder %v902_v12, 0.0  ;;  %v973_v22 = vmul.f32 %v2050_v3, %v902_v12  ;;  %v865_v23 = vmul.f32 %v2029_v54, %v707_v20  ;;  %v994_v24 = vmul.f32 %v2050_v3, %v923_v9 }
  0xf2   : > { %v905_v25 = vadd.f32 %v2038_v58, %v866_v19  ;;  %v1006_v29 = vsel %vm935_vm1, %v903_v8, %v974_v18  ;;  %v993_v37 = vmul.f32 %v2050_v3, %v922_v14  ;;  %vm954_vm6 = vcmp.ge.f32.partialorder %v922_v14, 0.0 }
  0xf3   : > { %v1005_v30 = vsel %vm934_vm3, %v902_v12, %v973_v22  ;;  %v904_v31 = vadd.f32 %v2038_v58, %v865_v23  ;;  %v1715_v32 = vpop.f32.mrb[4].mxu0  ;;  %v1745_v33 = vpop.f32.mrb[4].mxu1  ;;  %v1026_v36 = vsel %vm955_vm2, %v923_v9, %v994_v24  ;;  %v2087_v42 = vmul.f32 %v2042_v62, %v1006_v29 }
  0xf4   : > { %vm937_vm4 = vcmp.ge.f32.partialorder %v905_v25, 0.0  ;;  %v976_v35 = vmul.f32 %v2050_v3, %v905_v25  ;;  %v717_v38 = vpop.f32.mrb[5].mxu0  ;;  %v817_v39 = vpop.f32.mrb[5].mxu1  ;;  %v868_v41 = vmul.f32 %v1715_v32, %v2029_v54  ;;  %v2090_v43 = vmul.f32 %v2042_v62, %v1005_v30 }
  0xf5   : > { %vm936_vm5 = vcmp.ge.f32.partialorder %v904_v31, 0.0  ;;  %v975_v40 = vmul.f32 %v2050_v3, %v904_v31  ;;  %v867_v44 = vmul.f32 %v2029_v54, %v717_v38  ;;  %v886_v45 = vmul.f32 %v1742_v15, %v2029_v54 }
  0xf6   : > { %v1008_v46 = vsel %vm937_vm4, %v905_v25, %v976_v35  ;;  %v2095_v47 = vmul.f32 %v2045_v1, %v1026_v36  ;;  %v2098_v48 = vmul.f32 %v2053_v5, %v1026_v36  ;;  %v907_v49 = vadd.f32 %v2038_v58, %v868_v41 }
  0xf7   : > { %v1718_v50 = vpop.f32.mrb[6].mxu0  ;;  %v1748_v52 = vpop.f32.mrb[6].mxu1  ;;  %v1007_v53 = vsel %vm936_vm5, %v904_v31, %v975_v40  ;;  %v1025_v55 = vsel %vm954_vm6, %v922_v14, %v993_v37  ;;  %v906_v56 = vadd.f32 %v2038_v58, %v867_v44  ;;  %v925_v57 = vadd.f32 %v2038_v58, %v886_v45 }
  0xf8   : > { %v727_v59 = vpop.f32.mrb[7].mxu0  ;;  %v827_v60 = vpop.f32.mrb[7].mxu1  ;;  %vm939_vm7 = vcmp.ge.f32.partialorder %v907_v49, 0.0  ;;  %v978_v61 = vmul.f32 %v2050_v3, %v907_v49  ;;  %v885_v63 = vmul.f32 %v2029_v54, %v807_v21  ;;  %v870_v0 = vmul.f32 %v1718_v50, %v2029_v54 }
  0xf9   : > { %vm938_vm8 = vcmp.ge.f32.partialorder %v906_v56, 0.0  ;;  %v977_v2 = vmul.f32 %v2050_v3, %v906_v56  ;;  %vm957_vm9 = vcmp.ge.f32.partialorder %v925_v57, 0.0  ;;  %v996_v4 = vmul.f32 %v2050_v3, %v925_v57 }
  0xfa   : > { %v1010_v6 = vsel %vm939_vm7, %v907_v49, %v978_v61  ;;  %v924_v7 = vadd.f32 %v2038_v58, %v885_v63  ;;  %v909_v8 = vadd.f32 %v2038_v58, %v870_v0  ;;  %v888_v9 = vmul.f32 %v1745_v33, %v2029_v54 }
  0xfb   : > { %v1721_v10 = vpop.f32.mrb[8].mxu0  ;;  %v1751_v11 = vpop.f32.mrb[8].mxu1  ;;  %v2112_v12 = vmul.f32 %v2042_v62, %v1008_v46  ;;  %v2115_v13 = vmul.f32 %v2042_v62, %v1007_v53  ;;  %v2118_v14 = vmul.f32 %v2045_v1, %v1025_v55  ;;  %v869_v15 = vmul.f32 %v2029_v54, %v727_v59  ;;  %v2172_v59 = vld [vmem:[%s2656_s8 + $0x8] ss:$0 sm:$0xff] }
  0xfc   : > { %v737_v17 = vpop.f32.mrb[9].mxu0  ;;  %v2121_v18 = vpop.f32.mrb[9].mxu1  ;;  %v2124_v19 = vmul.f32 %v2042_v62, %v1010_v6  ;;  %v2127_v20 = vmul.f32 %v2053_v5, %v1025_v55  ;;  %v1009_v21 = vsel %vm938_vm8, %v906_v56, %v977_v2  ;;  %vm956_vm10 = vcmp.ge.f32.partialorder %v924_v7, 0.0 }
  0xfd   : > { %v1028_v22 = vsel %vm957_vm9, %v925_v57, %v996_v4  ;;  %v995_v23 = vmul.f32 %v2050_v3, %v924_v7  ;;  %v980_v24 = vmul.f32 %v2050_v3, %v909_v8  ;;  %v927_v25 = vadd.f32 %v2038_v58, %v888_v9 }
  0xfe   : > { %v908_v29 = vadd.f32 %v2038_v58, %v869_v15  ;;  %v887_v30 = vmul.f32 %v2029_v54, %v817_v39  ;;  %v890_v31 = vmul.f32 %v1748_v52, %v2029_v54  ;;  %v889_v32 = vmul.f32 %v2029_v54, %v827_v60 }
  0xff   : > { %v2139_v33 = vpop.f32.mrb[10].mxu0  ;;  %v2141_v35 = vpop.f32.mrb[10].mxu1  ;;  %v1027_v36 = vsel %vm956_vm10, %v924_v7, %v995_v23  ;;  %vm941_vm12 = vcmp.ge.f32.partialorder %v909_v8, 0.0  ;;  %vm959_vm13 = vcmp.ge.f32.partialorder %v927_v25, 0.0  ;;  %v998_v37 = vmul.f32 %v2050_v3, %v927_v25 }
 0x100   : > { %v2144_v38 = vpop.f32.mrb[11].mxu0  ;;  %v2146_v40 = vpop.f32.mrb[11].mxu1  ;;  %v2149_v41 = vmul.f32 %v2042_v62, %v1009_v21  ;;  %v2152_v39 = vmul.f32 %v2045_v1, %v1028_v22  ;;  %v2155_v44 = vmul.f32 %v2053_v5, %v1028_v22  ;;  %vm940_vm14 = vcmp.ge.f32.partialorder %v908_v29, 0.0 }
 0x101   : > { %v1030_v45 = vsel %vm959_vm13, %v927_v25, %v998_v37  ;;  %v979_v46 = vmul.f32 %v2050_v3, %v908_v29  ;;  %v926_v49 = vadd.f32 %v2038_v58, %v887_v30  ;;  %v929_v50 = vadd.f32 %v2038_v58, %v890_v31 }
 0x102   : > { %v2161_v52 = vmul.f32 %v2045_v1, %v1027_v36  ;;  %v2164_v53 = vmul.f32 %v2053_v5, %v1027_v36  ;;  %v1012_v55 = vsel %vm941_vm12, %v909_v8, %v980_v24  ;;  %v928_v56 = vadd.f32 %v2038_v58, %v889_v32 }
 0x103   : > { %v2167_v57 = vpop.f32.mrb[12].mxu0  ;;  %v1131_v60 = vrot.slane %v1030_v45, 7  ;;  %vm958_vm15 = vcmp.ge.f32.partialorder %v926_v49, 0.0  ;;  %v997_v61 = vmul.f32 %v2050_v3, %v926_v49  ;;  %vm961_vm0 = vcmp.ge.f32.partialorder %v929_v50, 0.0 }
 0x104   : > { %v2175_v63 = vpop.f32.mrb[13].mxu0  ;;  %v1011_v0 = vsel %vm940_vm14, %v908_v29, %v979_v46  ;;  %v1000_v2 = vmul.f32 %v2050_v3, %v929_v50  ;;  %vm960_vm1 = vcmp.ge.f32.partialorder %v928_v56, 0.0  ;;  %v999_v4 = vmul.f32 %v2050_v3, %v928_v56 }
 0x105   : > { %v2181_v6 = vmul.f32 %v2042_v62, %v1012_v55  ;;  %v2183_v7 = vsel %vm958_vm15, %v926_v49, %v997_v61  ;;  %v872_v8 = vmul.f32 %v1721_v10, %v2029_v54  ;;  %v892_v9 = vmul.f32 %v1751_v11, %v2029_v54 }
 0x106   : > { %v2188_v15 = vmul.f32 %v2172_v59, %v1030_v45  ;;  %v2664_v21 = vrot.slane %v2183_v7, 7  ;;  %v2191_v22 = vsel %vm961_vm0, %v929_v50, %v1000_v2  ;;  %v871_v23 = vmul.f32 %v2029_v54, %v737_v17 }
 0x107   : > { %v2194_v24 = vpop.f32.mrb[14].mxu0  ;;  %v2197_v25 = vmul.f32 %v2063_v16, %v1030_v45  ;;  %v2200_v29 = vmul.f32 %v2042_v62, %v1011_v0  ;;  %v2665_v10 = vrot.slane %v2191_v22, 7  ;;  %v1031_v11 = vsel %vm960_vm1, %v928_v56, %v999_v4 }
 0x108   : > { %2667 = vst [vmem:[#allocation2_spill] sm:$0xff] %v2188_v15  ;;  %v2203_v30 = vpop.f32.mrb[15].mxu0  ;;  %v2207_v31 = vmul.f32 %v2172_v59, %v2183_v7  ;;  %v1144_v17 = vsel %vm1121_vm11, %v2664_v21, %v1131_v60  ;;  %v2215_v32 = vmul.f32 %v2063_v16, %v2183_v7  ;;  %v1132_v62 = vrot.slane %v1031_v11, 7 }
 0x109   : > { %v2219_v36 = vmul.f32 %v2172_v59, %v2191_v22  ;;  %v2223_v37 = vmul.f32 %v2063_v16, %v2191_v22  ;;  %v911_v45 = vadd.f32 %v2038_v58, %v872_v8  ;;  %v931_v46 = vadd.f32 %v2038_v58, %v892_v9 }
 0x10a   : > { %2668 = vst [vmem:[#allocation3_spill] sm:$0xff] %v2207_v31  ;;  %2669 = vst [vmem:[#allocation4_spill] sm:$0xff] %v2215_v32  ;;  %v1142_v49 = vsel %vm1121_vm11, %v1132_v62, %v2665_v10  ;;  %v1143_v50 = vsel %vm1121_vm11, %v1131_v60, %v1132_v62  ;;  %v910_v55 = vadd.f32 %v2038_v58, %v871_v23 }
 0x10b   : > { %2670 = vst [vmem:[#allocation5_spill] sm:$0xff] %v2219_v36  ;;  %2671 = vst [vmem:[#allocation6_spill] sm:$0xff] %v2223_v37  ;;  %v891_v56 = vmul.f32 %v2029_v54, %v2121_v18  ;;  %v2236_v61 = vpop.f32.mrb[16].mxu0  ;;  %v1171_v0 = vmul.f32 %v2072_v26, %v1144_v17  ;;  %v2240_v2 = vmul.f32 %v2074_v27, %v1144_v17  ;;  %vm943_vm2 = vcmp.ge.f32.partialorder %v911_v45, 0.0 }
 0x10c   : > { %v2243_v4 = vmul.f32 %v2172_v59, %v1031_v11  ;;  %v2246_v8 = vmul.f32 %v2063_v16, %v1031_v11  ;;  %v2248_v9 = vpop.f32.mrb[17].mxu0  ;;  %v982_v60 = vmul.f32 %v2050_v3, %v911_v45  ;;  %vm963_vm3 = vcmp.ge.f32.partialorder %v931_v46, 0.0 }
 0x10d   : > { %2672 = vst [vmem:[#allocation7_spill] sm:$0xff] %v2240_v2  ;;  %v1002_v18 = vmul.f32 %v2050_v3, %v931_v46  ;;  %vm942_vm4 = vcmp.ge.f32.partialorder %v910_v55, 0.0  ;;  %v981_v23 = vmul.f32 %v2050_v3, %v910_v55  ;;  %v930_v17 = vadd.f32 %v2038_v58, %v891_v56 }
 0x10e   : > { %2673 = vst [vmem:[#allocation8_spill] sm:$0xff] %v2243_v4  ;;  %2674 = vst [vmem:[#allocation9_spill] sm:$0xff] %v2246_v8  ;;  %v874_v62 = vmul.f32 %v2139_v33, %v2029_v54  ;;  %v2257_v21 = vmul.f32 %v2072_v26, %v1143_v50  ;;  %v2259_v11 = vsel %vm943_vm2, %v911_v45, %v982_v60 }
 0x10f   : > { %v2261_v10 = vsel %vm963_vm3, %v931_v46, %v1002_v18  ;;  %v894_v2 = vmul.f32 %v2141_v35, %v2029_v54  ;;  %v2265_v4 = vpop.f32.mrb[18].mxu0  ;;  %v1056_v8 = vmul.f32 %v2076_v28, %v2259_v11  ;;  %v873_v33 = vmul.f32 %v2029_v54, %v2144_v38 }
 0x110   : > { %v2273_v37 = vpop.f32.mrb[19].mxu0  ;;  %v1232_v45 = vmul.f32 %v2063_v16, %v2261_v10  ;;  %v2277_v46 = vsel %vm942_vm4, %v910_v55, %v981_v23  ;;  %vm962_vm5 = vcmp.ge.f32.partialorder %v930_v17, 0.0  ;;  %v1001_v35 = vmul.f32 %v2050_v3, %v930_v17 }
 0x111   : > { %2675 = vst [vmem:[#allocation10_spill] sm:$0xff] %v2273_v37  ;;  %v2281_v60 = vadd.f32 %v1056_v8, %v2087_v42  ;;  %v1055_v18 = vmul.f32 %v2076_v28, %v2277_v46  ;;  %v2666_v36 = vrot.slane %v2277_v46, 7  ;;  %v913_v38 = vadd.f32 %v2038_v58, %v874_v62 }
 0x112   : > { %v2288_v56 = vmul.f32 %v2072_v26, %v1142_v49  ;;  %v1240_v31 = vadd.f32 %v1232_v45, %v2098_v48  ;;  %v1033_v55 = vsel %vm962_vm5, %v930_v17, %v1001_v35  ;;  %v933_v23 = vadd.f32 %v2038_v58, %v894_v2  ;;  %v1208_v48 = vld [vmem:[%s2649_s1 + $0x30] sm:$0xff] }
 0x113   : > { %v2293_v32 = vmul.f32 %v2074_v27, %v1143_v50  ;;  %v2296_v42 = vadd.f32 %v1055_v18, %v2090_v43  ;;  %v2678_v8 = vrot.slane %v2259_v11, 7  ;;  %v1134_v37 = vrot.slane %v1033_v55, 7 }
 0x114   : > { %v1231_v50 = vmul.f32 %v2063_v16, %v1033_v55  ;;  %vm945_vm6 = vcmp.ge.f32.partialorder %v913_v38, 0.0  ;;  %v912_v43 = vadd.f32 %v2038_v58, %v873_v33  ;;  %v2311_v17 = vmul.f32 %v2074_v27, %v1142_v49 }
 0x115   : > { %2676 = vst [vmem:[#allocation11_spill] sm:$0xff] %v2293_v32  ;;  %2677 = vst [vmem:[#allocation12_spill] sm:$0xff] %v2296_v42  ;;  %v1128_v62 = vsel %vm1121_vm11, %v2666_v36, %v2678_v8  ;;  %v2680_v45 = vrot.slane %v2261_v10, 7  ;;  %v2681_v18 = vrot.slane %v2191_v22, 7  ;;  %v2324_v36 = vmul.f32 %v2172_v59, %v2261_v10 }
 0x116   : > { %v1159_v2 = vmul.f32 %v2079_v34, %v1128_v62  ;;  %2679 = vst [vmem:[#allocation13_spill] sm:$0xff] %v2311_v17  ;;  %v984_v62 = vmul.f32 %v2050_v3, %v913_v38  ;;  %v1239_v49 = vadd.f32 %v1231_v50, %v2127_v20  ;;  %vm965_vm7 = vcmp.ge.f32.partialorder %v933_v23, 0.0 }
 0x117   : > { %v1140_v35 = vsel %vm1121_vm11, %v1134_v37, %v2680_v45  ;;  %v1141_v8 = vsel %vm1121_vm11, %v2681_v18, %v1134_v37  ;;  %v2329_v32 = vmul.f32 %v1240_v31, %v1208_v48  ;;  %v2332_v45 = vmul.f32 %v2172_v59, %v1033_v55 }
 0x118   : > { %v2326_v33 = vadd.f32 %v1171_v0, %v1159_v2  ;;  %v2334_v22 = vsel %vm945_vm6, %v913_v38, %v984_v62  ;;  %v1004_v37 = vmul.f32 %v2050_v3, %v933_v23  ;;  %v2338_v18 = vmul.f32 %v2072_v26, %v1141_v8 }
 0x119   : > { %2682 = vst [vmem:[#allocation14_spill] sm:$0xff] %v2329_v32  ;;  %v2341_v17 = vmul.f32 %v2072_v26, %v1140_v35  ;;  %v1058_v0 = vmul.f32 %v2076_v28, %v2334_v22  ;;  %vm944_vm8 = vcmp.ge.f32.partialorder %v912_v43, 0.0  ;;  %v983_v31 = vmul.f32 %v2050_v3, %v912_v43 }
 0x11a   : > { %v1036_v20 = vsel %vm965_vm7, %v933_v23, %v1004_v37  ;;  %v893_v55 = vmul.f32 %v2029_v54, %v2146_v40  ;;  %v876_v38 = vmul.f32 %v2167_v57, %v2029_v54  ;;  %v1207_v23 = vld [vmem:[%s2649_s1 + $0x28] sm:$0xff]  ;;  %v2359_v37 = vmul.f32 %v2074_v27, %v1141_v8 }
 0x11b   : > { %v2351_v48 = vadd.f32 %v1058_v0, %v2112_v12  ;;  %v1137_v50 = vrot.slane %v1036_v20, 7  ;;  %v1226_v62 = vmul.f32 %v2063_v16, %v1036_v20  ;;  %v1015_v32 = vsel %vm944_vm8, %v912_v43, %v983_v31 }
 0x11c   : > { %v932_v40 = vadd.f32 %v2038_v58, %v893_v55  ;;  %v915_v57 = vadd.f32 %v2038_v58, %v876_v38  ;;  %v2684_v12 = vrot.slane %v2183_v7, 7  ;;  %v1113_v42 = vrot.slane %v1015_v32, 7 }
 0x11d   : > { %2683 = vst [vmem:[#allocation15_spill] sm:$0xff] %v2351_v48  ;;  %v1234_v2 = vadd.f32 %v1226_v62, %v2155_v44  ;;  %v1057_v48 = vmul.f32 %v2076_v28, %v1015_v32  ;;  %v2370_v15 = vmul.f32 %v2074_v27, %v1140_v35  ;;  %v875_v8 = vmul.f32 %v2029_v54, %v2175_v63 }
 0x11e   : > { %v1145_v0 = vsel %vm1121_vm11, %v1137_v50, %v2684_v12  ;;  %vm964_vm9 = vcmp.ge.f32.partialorder %v932_v40, 0.0  ;;  %v1003_v43 = vmul.f32 %v2050_v3, %v932_v40  ;;  %v2375_v31 = vmul.f32 %v1239_v49, %v1207_v23 }
 0x11f   : > { %v2378_v7 = vadd.f32 %v1057_v48, %v2115_v13  ;;  %v2685_v55 = vrot.slane %v2334_v22, 7  ;;  %v2686_v32 = vrot.slane %v2259_v11, 7  ;;  %v1271_v38 = vmul.f32 %v2074_v27, %v1145_v0  ;;  %v1202_v48 = vld [vmem:[%s2649_s1] sm:$0xff]  ;;  %v1259_v11 = vld [vmem:[%s2651_s3 + $0x8] sm:$0xff] }
 0x120   : > { %v1035_v49 = vsel %vm964_vm9, %v932_v40, %v1003_v43  ;;  %v2392_v13 = vmul.f32 %v2172_v59, %v1036_v20  ;;  %vm947_vm10 = vcmp.ge.f32.partialorder %v915_v57, 0.0  ;;  %v986_v20 = vmul.f32 %v2050_v3, %v915_v57 }
 0x121   : > { %v1126_v44 = vsel %vm1121_vm11, %v1113_v42, %v2685_v55  ;;  %v1127_v35 = vsel %vm1121_vm11, %v2686_v32, %v1113_v42  ;;  %v1136_v23 = vrot.slane %v1035_v49, 7  ;;  %v1233_v42 = vmul.f32 %v2063_v16, %v1035_v49 }
 0x122   : > { %v1160_v62 = vmul.f32 %v2079_v34, %v1127_v35  ;;  %v1161_v63 = vmul.f32 %v2079_v34, %v1126_v44  ;;  %v914_v43 = vadd.f32 %v2038_v58, %v875_v8  ;;  %v2687_v44 = vrot.slane %v2261_v10, 7 }
 0x123   : > { %v1138_v55 = vsel %vm1121_vm11, %v1136_v23, %v1137_v50  ;;  %v1241_v16 = vadd.f32 %v1233_v42, %v2164_v53  ;;  %v2421_v35 = vmul.f32 %v1234_v2, %v1202_v48  ;;  %v2426_v8 = vmul.f32 %v2172_v59, %v1035_v49 }
 0x124   : > { %v2402_v12 = vadd.f32 %v2257_v21, %v1160_v62  ;;  %v2405_v40 = vadd.f32 %v2288_v56, %v1161_v63  ;;  %v2415_v32 = vsel %vm1121_vm11, %v2687_v44, %v1136_v23  ;;  %v878_v21 = vmul.f32 %v2194_v24, %v2029_v54 }
 0x125   : > { %v1170_v56 = vmul.f32 %v2072_v26, %v1145_v0  ;;  %v2423_v62 = vmul.f32 %v1271_v38, %v1259_v11  ;;  %v2430_v10 = vmul.f32 %v2072_v26, %v2415_v32  ;;  %v1018_v50 = vsel %vm947_vm10, %v915_v57, %v986_v20 }
 0x126   : > { %vm946_vm12 = vcmp.ge.f32.partialorder %v914_v43, 0.0  ;;  %v985_v53 = vmul.f32 %v2050_v3, %v914_v43  ;;  %v1060_v63 = vmul.f32 %v2076_v28, %v1018_v50  ;;  %v1116_v24 = vrot.slane %v1018_v50, 7 }
 0x127   : > { %v917_v0 = vadd.f32 %v2038_v58, %v878_v21  ;;  %v877_v2 = vmul.f32 %v2029_v54, %v2203_v30  ;;  %v2438_v38 = vmul.f32 %v2072_v26, %v1138_v55  ;;  %v880_v49 = vmul.f32 %v2236_v61, %v2029_v54 }
 0x128   : > { %v1017_v59 = vsel %vm946_vm12, %v914_v43, %v985_v53  ;;  %v879_v57 = vmul.f32 %v2029_v54, %v2248_v9  ;;  %v1068_v48 = vadd.f32 %v1060_v63, %v2124_v19  ;;  %v2688_v19 = vrot.slane %v2334_v22, 7 }
 0x129   : > { %v1059_v11 = vmul.f32 %v2076_v28, %v1017_v59  ;;  %v1115_v23 = vrot.slane %v1017_v59, 7  ;;  %vm949_vm13 = vcmp.ge.f32.partialorder %v917_v0, 0.0  ;;  %v988_v42 = vmul.f32 %v2050_v3, %v917_v0 }
 0x12a   : > { %v916_v30 = vadd.f32 %v2038_v58, %v877_v2  ;;  %v919_v26 = vadd.f32 %v2038_v58, %v880_v49  ;;  %v918_v20 = vadd.f32 %v2038_v58, %v879_v57  ;;  %v1088_v43 = vadd.f32 %v2095_v47, %v1068_v48  ;;  %v1209_v47 = vld [vmem:[%s2649_s1 + $0x38] sm:$0xff] }
 0x12b   : > { %v1067_v61 = vadd.f32 %v1059_v11, %v2149_v41  ;;  %v1124_v9 = vsel %vm1121_vm11, %v1115_v23, %v1116_v24  ;;  %v1125_v44 = vsel %vm1121_vm11, %v2688_v19, %v1115_v23  ;;  %v1020_v53 = vsel %vm949_vm13, %v917_v0, %v988_v42 }
 0x12c   : > { %v1162_v21 = vmul.f32 %v2079_v34, %v1125_v44  ;;  %v1163_v50 = vmul.f32 %v2079_v34, %v1124_v9  ;;  %vm948_vm14 = vcmp.ge.f32.partialorder %v916_v30, 0.0  ;;  %v2464_v41 = vadd.f32 %v2324_v36, %v1088_v43 }
 0x12d   : > { %v1087_v63 = vadd.f32 %v2118_v14, %v1067_v61  ;;  %v1062_v22 = vmul.f32 %v2076_v28, %v1020_v53  ;;  %v1118_v2 = vrot.slane %v1020_v53, 7  ;;  %v987_v57 = vmul.f32 %v2050_v3, %v916_v30 }
 0x12e   : > { %v1182_v59 = vadd.f32 %v2338_v18, %v1162_v21  ;;  %v1183_v49 = vadd.f32 %v2341_v17, %v1163_v50  ;;  %vm951_vm15 = vcmp.ge.f32.partialorder %v919_v26, 0.0  ;;  %v2689_v36 = vrot.slane %v2277_v46, 7 }
 0x12f   : > { %v2472_v0 = vadd.f32 %v2332_v45, %v1087_v63  ;;  %v1070_v48 = vadd.f32 %v1062_v22, %v2181_v6  ;;  %v990_v11 = vmul.f32 %v2050_v3, %v919_v26  ;;  %v2480_v23 = vmul.f32 %v1241_v16, %v1209_v47  ;;  %v1147_v16 = vld [vmem:[%s2650_s2 + $0x8] sm:$0xff]  ;;  %v2690_v63 = vld [vmem:[#allocation2_spill] sm:$0xff] }
 0x130   : > { %v1129_v14 = vsel %vm1121_vm11, %v1118_v2, %v2689_v36  ;;  %v1270_v18 = vmul.f32 %v2074_v27, %v1138_v55  ;;  %v1019_v42 = vsel %vm948_vm14, %v916_v30, %v987_v57  ;;  %vm950_vm0 = vcmp.ge.f32.partialorder %v918_v20, 0.0  ;;  %v1150_v55 = vld [vmem:[%s2650_s2 + $0x20] sm:$0xff]  ;;  %v1152_v57 = vld [vmem:[%s2650_s2 + $0x30] sm:$0xff] }
 0x131   : > { %v1158_v17 = vmul.f32 %v2079_v34, %v1129_v14  ;;  %v1090_v45 = vadd.f32 %v2152_v39, %v1070_v48  ;;  %v1061_v43 = vmul.f32 %v2076_v28, %v1019_v42  ;;  %v1117_v6 = vrot.slane %v1019_v42, 7  ;;  %v1258_v14 = vld [vmem:[%s2651_s3] sm:$0xff] }
 0x132   : > { %v1022_v61 = vsel %vm951_vm15, %v919_v26, %v990_v11  ;;  %v1151_v26 = vld [vmem:[%s2650_s2 + $0x28] sm:$0xff]  ;;  %v1187_v53 = vmul.f32 %v2326_v33, %v1147_v16  ;;  %v989_v51 = vmul.f32 %v2050_v3, %v918_v20  ;;  %v882_v47 = vmul.f32 %v2265_v4, %v2029_v54  ;;  %v1153_v4 = vld [vmem:[%s2650_s2 + $0x38] sm:$0xff]  ;;  %v2693_v16 = vld [vmem:[#allocation4_spill] sm:$0xff] }
 0x133   : > { %v1178_v46 = vadd.f32 %v1170_v56, %v1158_v17  ;;  %v1076_v9 = vmul.f32 %v2045_v1, %v1022_v61  ;;  %v1216_v19 = vmul.f32 %v2053_v5, %v1022_v61  ;;  %v2496_v39 = vadd.f32 %v2392_v13, %v1090_v45  ;;  %v2691_v17 = vld [vmem:[#allocation10_spill] sm:$0xff] }
 0x134   : > { %v1069_v28 = vadd.f32 %v1061_v43, %v2200_v29  ;;  %v1122_v56 = vsel %vm1121_vm11, %v1117_v6, %v1118_v2  ;;  %v1123_v30 = vsel %vm1121_vm11, %v1116_v24, %v1117_v6  ;;  %v1146_v24 = vld [vmem:[%s2650_s2] sm:$0xff]  ;;  %v1191_v22 = vmul.f32 %v1183_v49, %v1151_v26  ;;  %v2692_v6 = vld [vmem:[#allocation12_spill] sm:$0xff] }
 0x135   : > { %v1164_v44 = vmul.f32 %v2079_v34, %v1123_v30  ;;  %v1165_v21 = vmul.f32 %v2079_v34, %v1122_v56  ;;  %v1084_v50 = vadd.f32 %v1076_v9, %v2281_v60  ;;  %v2510_v13 = vadd.f32 %v2197_v25, %v1216_v19  ;;  %v1149_v34 = vld [vmem:[%s2650_s2 + $0x18] sm:$0xff]  ;;  %v1262_v9 = vld [vmem:[%s2651_s3 + $0x20] sm:$0xff]  ;;  %v2694_v56 = vld [vmem:[#allocation3_spill] sm:$0xff] }
 0x136   : > { %v1089_v29 = vadd.f32 %v2161_v52, %v1069_v28  ;;  %v1190_v60 = vmul.f32 %v1182_v59, %v1150_v55  ;;  %v1021_v48 = vsel %vm950_vm0, %v918_v20, %v989_v51  ;;  %v921_v59 = vadd.f32 %v2038_v58, %v882_v47 }
 0x137   : > { %v1184_v25 = vadd.f32 %v2430_v10, %v1164_v44  ;;  %v1185_v52 = vadd.f32 %v2438_v38, %v1165_v21  ;;  %v1104_v33 = vadd.f32 %v2690_v63, %v1084_v50  ;;  %v1148_v10 = vld [vmem:[%s2650_s2 + $0x10] sm:$0xff]  ;;  %v1075_v49 = vmul.f32 %v2045_v1, %v1021_v48 }
 0x138   : > { %v1109_v2 = vadd.f32 %v2426_v8, %v1089_v29  ;;  %v1186_v8 = vmul.f32 %v1178_v46, %v1146_v24  ;;  %v1189_v36 = vmul.f32 %v2405_v40, %v1149_v34  ;;  %v1215_v11 = vmul.f32 %v2053_v5, %v1021_v48  ;;  %v1203_v40 = vld [vmem:[%s2649_s1 + $0x8] sm:$0xff]  ;;  %v1206_v29 = vld [vmem:[%s2649_s1 + $0x20] sm:$0xff] }
 0x139   : > { %v1195_v38 = vadd.f32 %v1187_v53, %v1104_v33  ;;  %vm953_vm11 = vcmp.ge.f32.partialorder %v921_v59, 0.0  ;;  %v992_v20 = vmul.f32 %v2050_v3, %v921_v59  ;;  %v881_v42 = vmul.f32 %v2029_v54, %v2691_v17  ;;  %v2696_v24 = vld [vmem:[#allocation15_spill] sm:$0xff]  ;;  %v2697_v34 = vld [vmem:[#allocation6_spill] sm:$0xff] }
 0x13a   : > { %v1192_v45 = vmul.f32 %v1184_v25, %v1152_v57  ;;  %v1193_v43 = vmul.f32 %v1185_v52, %v1153_v4  ;;  %v1083_v61 = vadd.f32 %v1075_v49, %v2692_v6  ;;  %v1188_v46 = vmul.f32 %v2402_v12, %v1148_v10  ;;  %v1263_v12 = vld [vmem:[%s2651_s3 + $0x28] sm:$0xff]  ;;  %v2698_v57 = vld [vmem:[#allocation5_spill] sm:$0xff]  ;;  %v1264_v10 = vld [vmem:[%s2651_s3 + $0x30] sm:$0xff] }
 0x13b   : > { %v1235_v19 = vadd.f32 %v2693_v16, %v1215_v11  ;;  %v1024_v55 = vsel %vm953_vm11, %v921_v59, %v992_v20  ;;  %v920_v28 = vadd.f32 %v2038_v58, %v881_v42  ;;  %v1278_v54 = vmul.f32 %v1270_v18, %v1258_v14  ;;  %v2695_v18 = vld [vmem:[#allocation13_spill] sm:$0xff]  ;;  %v2701_v6 = vld [vmem:[#allocation8_spill] sm:$0xff] }
 0x13c   : > { %v1103_v30 = vadd.f32 %v2694_v56, %v1083_v61  ;;  %v1078_v26 = vmul.f32 %v2045_v1, %v1024_v55  ;;  %v1218_v44 = vmul.f32 %v2053_v5, %v1024_v55  ;;  %v1198_v21 = vadd.f32 %v1190_v60, %v2472_v0  ;;  %v2700_v14 = vld [vmem:[#allocation9_spill] sm:$0xff] }
 0x13d   : > { %v1243_v50 = vmul.f32 %v1235_v19, %v1203_v40  ;;  %vm952_vm1 = vcmp.ge.f32.partialorder %v920_v28, 0.0  ;;  %v991_v58 = vmul.f32 %v2050_v3, %v920_v28  ;;  %v1282_v53 = vmul.f32 %v2695_v18, %v1262_v9 }
 0x13e   : > { %v1194_v51 = vadd.f32 %v1186_v8, %v1103_v30  ;;  %v1086_v47 = vadd.f32 %v1078_v26, %v2696_v24  ;;  %v1238_v25 = vadd.f32 %v2697_v34, %v1218_v44  ;;  %v1199_v0 = vadd.f32 %v1191_v22, %v2464_v41  ;;  %v1205_v41 = vld [vmem:[%s2649_s1 + $0x18] sm:$0xff]  ;;  %v2702_v30 = vld [vmem:[#allocation11_spill] sm:$0xff] }
 0x13f   : > { %v1251_v60 = vadd.f32 %v1243_v50, %v1195_v38  ;;  %v1023_v52 = vsel %vm952_vm1, %v920_v28, %v991_v58  ;;  %v1283_v63 = vmul.f32 %v2359_v37, %v1263_v12  ;;  %v1200_v33 = vadd.f32 %v1192_v45, %v1109_v2  ;;  %v2699_v2 = vld [vmem:[#allocation14_spill] sm:$0xff]  ;;  %v1260_v28 = vld [vmem:[%s2651_s3 + $0x10] sm:$0xff] }
 0x140   : > { %v1106_v4 = vadd.f32 %v2698_v57, %v1086_v47  ;;  %v1246_v48 = vmul.f32 %v1238_v25, %v1206_v29  ;;  %v1077_v59 = vmul.f32 %v2045_v1, %v1023_v52  ;;  %v1217_v3 = vmul.f32 %v2053_v5, %v1023_v52  ;;  %v1204_v1 = vld [vmem:[%s2649_s1 + $0x10] sm:$0xff]  ;;  %v2703_v29 = vld [vmem:[#allocation7_spill] sm:$0xff] }
 0x141   : > { %v1287_v49 = vadd.f32 %v2423_v62, %v1251_v60  ;;  %v1250_v37 = vadd.f32 %v2421_v35, %v1194_v51  ;;  %v1255_v22 = vadd.f32 %v2375_v31, %v1199_v0  ;;  %v1256_v38 = vadd.f32 %v2699_v2, %v1200_v33  ;;  %v1632_v62 = vld [vmem:[%s2657_s9] ss:$0 sm:$0xff]  ;;  %v1261_v31 = vld [vmem:[%s2651_s3 + $0x18] sm:$0xff] }
 0x142   : > { %v1197_v5 = vadd.f32 %v1189_v36, %v1106_v4  ;;  %v1085_v8 = vadd.f32 %v1077_v59, %v2378_v7  ;;  %v1237_v11 = vadd.f32 %v2700_v14, %v1217_v3  ;;  %v1254_v20 = vadd.f32 %v1246_v48, %v1198_v21  ;;  %v1633_v7 = vld [vmem:[%s2658_s10] ss:$0 sm:$0xff] }
 0x143   : > { %v1286_v17 = vadd.f32 %v1278_v54, %v1250_v37  ;;  %v1302_v35 = vmul.f32 %v1632_v62, %v1287_v49  ;;  %v1291_v42 = vadd.f32 %v1283_v63, %v1255_v22  ;;  %v1284_v45 = vmul.f32 %v2370_v15, %v1264_v10  ;;  %v1643_v14 = vld [vmem:[%s2661_s13] ss:$0 sm:$0xff] }
 0x144   : > { %v1105_v36 = vadd.f32 %v2701_v6, %v1085_v8  ;;  %v1245_v61 = vmul.f32 %v1237_v11, %v1205_v41  ;;  %v1290_v40 = vadd.f32 %v1282_v53, %v1254_v20  ;;  %v1201_v9 = vadd.f32 %v1193_v43, %v2496_v39  ;;  %v1634_v39 = vld [vmem:[%s2659_s11] ss:$0 sm:$0xff] }
 0x145   : > { %v1244_v16 = vmul.f32 %v2510_v13, %v1204_v1  ;;  %v1301_v19 = vmul.f32 %v1632_v62, %v1286_v17  ;;  %v1317_v55 = vadd.f32 %v1633_v7, %v1302_v35  ;;  %v1292_v54 = vadd.f32 %v1284_v45, %v1256_v38 }
 0x146   : > { %v1196_v15 = vadd.f32 %v1188_v46, %v1105_v36  ;;  %v1253_v56 = vadd.f32 %v1245_v61, %v1197_v5  ;;  %v1281_v26 = vmul.f32 %v2702_v30, %v1261_v31  ;;  %v1257_v44 = vadd.f32 %v2480_v23, %v1201_v9  ;;  %v1265_v46 = vld [vmem:[%s2651_s3 + $0x38] sm:$0xff] }
 0x147   : > { %v1277_v21 = vmul.f32 %v2074_v27, %v2415_v32  ;;  %v1316_v12 = vadd.f32 %v1633_v7, %v1301_v19  ;;  %v1305_v13 = vmul.f32 %v1632_v62, %v1290_v40  ;;  %v1340_v43 = vmul.f32 %v1634_v39, %v1317_v55 }
 0x148   : > { %v1252_v50 = vadd.f32 %v1244_v16, %v1196_v15  ;;  %v1280_v58 = vmul.f32 %v2703_v29, %v1260_v28  ;;  %v1289_v18 = vadd.f32 %v1281_v26, %v1253_v56  ;;  %vm1363_vm3 = vcmask 523264  }
 0x149   : > { %vm1324_vm2 = vcmp.ge.f32.partialorder %v1316_v12, 0.0  ;;  %v1339_v23 = vmul.f32 %v1634_v39, %v1316_v12  ;;  %vm1325_vm4 = vcmp.ge.f32.partialorder %v1317_v55, 0.0  ;;  %v1320_v51 = vadd.f32 %v1633_v7, %v1305_v13 }
 0x14a   : > { %v1288_v27 = vadd.f32 %v1280_v58, %v1252_v50  ;;  %v1304_v32 = vmul.f32 %v1632_v62, %v1289_v18  ;;  %v1306_v24 = vmul.f32 %v1632_v62, %v1291_v42  ;;  %v1285_v47 = vmul.f32 %v1277_v21, %v1265_v46 }
 0x14b   : > { %v1347_v53 = vsel %vm1324_vm2, %v1316_v12, %v1339_v23  ;;  %v1348_v34 = vsel %vm1325_vm4, %v1317_v55, %v1340_v43  ;;  %v1307_v60 = vmul.f32 %v1632_v62, %v1292_v54  ;;  %v1343_v57 = vmul.f32 %v1634_v39, %v1320_v51 }
 0x14c   : > { %1771 = vmatprep.mubr.msk.f32.mxu1 %vm1363_vm3, %v1347_v53  ;;  %v1303_v25 = vmul.f32 %v1632_v62, %v1288_v27  ;;  %v1319_v0 = vadd.f32 %v1633_v7, %v1304_v32  ;;  %v1293_v52 = vadd.f32 %v1285_v47, %v1257_v44  ;;  %v1321_v4 = vadd.f32 %v1633_v7, %v1306_v24 }
 0x14d   : > { %1772 = vmatmul.mubr.msk.f32.vlgmr.msra.gmra.mrb[12].mxu1 %vm1363_vm3, %v1348_v34  ;;  %v1322_v3 = vadd.f32 %v1633_v7, %v1307_v60  ;;  %vm1328_vm7 = vcmp.ge.f32.partialorder %v1320_v51, 0.0 }
 0x14e   : > { %v1318_v63 = vadd.f32 %v1633_v7, %v1303_v25  ;;  %v1342_v33 = vmul.f32 %v1634_v39, %v1319_v0  ;;  %v1308_v48 = vmul.f32 %v1632_v62, %v1293_v52  ;;  %vm1327_vm6 = vcmp.ge.f32.partialorder %v1319_v0, 0.0  ;;  %v1644_v62 = vld [vmem:[%s2662_s14] ss:$0 sm:$0xff] }
 0x14f   : > { %v1344_v41 = vmul.f32 %v1634_v39, %v1321_v4  ;;  %v1351_v22 = vsel %vm1328_vm7, %v1320_v51, %v1343_v57  ;;  %vm1329_vm8 = vcmp.ge.f32.partialorder %v1321_v4, 0.0  ;;  %v1345_v2 = vmul.f32 %v1634_v39, %v1322_v3 }
 0x150   : > { %vm1326_vm5 = vcmp.ge.f32.partialorder %v1318_v63, 0.0  ;;  %v1341_v59 = vmul.f32 %v1634_v39, %v1318_v63  ;;  %v1350_v49 = vsel %vm1327_vm6, %v1319_v0, %v1342_v33  ;;  %v1323_v37 = vadd.f32 %v1633_v7, %v1308_v48 }
 0x151   : > { %vm1330_vm9 = vcmp.ge.f32.partialorder %v1322_v3, 0.0  ;;  %v1352_v38 = vsel %vm1329_vm8, %v1321_v4, %v1344_v41 }
 0x152   : > { %v1349_v10 = vsel %vm1326_vm5, %v1318_v63, %v1341_v59  ;;  %v1346_v1 = vmul.f32 %v1634_v39, %v1323_v37  ;;  %v1353_v5 = vsel %vm1330_vm9, %v1322_v3, %v1345_v2  ;;  %vm1331_vm10 = vcmp.ge.f32.partialorder %v1323_v37, 0.0 }
 0x153   : > { %1774 = vmatprep.mubr.msk.f32.mxu1 %vm1363_vm3, %v1349_v10 }
 0x154   : > { %1775 = vmatmul.mubr.msk.f32.gmra.mrb[14].mxu1 %vm1363_vm3, %v1350_v49  ;;  %v1354_v8 = vsel %vm1331_vm10, %v1323_v37, %v1346_v1 }
 0x155   : > { %1777 = vmatprep.mubr.msk.f32.mxu1 %vm1363_vm3, %v1351_v22 }
 0x158   : > { %1778 = vmatmul.mubr.msk.f32.gmra.mrb[16].mxu1 %vm1363_vm3, %v1352_v38 }
 0x159   : > { %1780 = vmatprep.mubr.msk.f32.mxu1 %vm1363_vm3, %v1353_v5 }
 0x15c   : > { %1781 = vmatmul.mubr.msk.f32.gmra.mrb[18].mxu1 %vm1363_vm3, %v1354_v8 }
 0x220   : > { %v1773_v11 = vpop.f32.mrb[12].mxu1 }
 0x221   : > { %v1501_v20 = vmul.f32 %v1773_v11, %v1643_v14  ;;  %v1454_v17 = vpop.f32.mrb[13].mxu1 }
 0x222   : > { %v1500_v35 = vmul.f32 %v1643_v14, %v1454_v17 }
 0x223   : > { %v1516_v31 = vadd.f32 %v1644_v62, %v1501_v20 }
 0x224   : > { %v1515_v42 = vadd.f32 %v1644_v62, %v1500_v35 }
 0x225   : > { %1524 = vst.msk [vmem:[%s496_s30 + $0x8] sm:$0xff] %vm1363_vm3, %v1516_v31 }
 0x226   : > { %1523 = vst.msk [vmem:[%s496_s30] sm:$0xff] %vm1363_vm3, %v1515_v42 }
 0x227   : > { %v1776_v45 = vpop.f32.mrb[14].mxu1 }
 0x228   : > { %v1503_v6 = vmul.f32 %v1776_v45, %v1643_v14  ;;  %v1464_v36 = vpop.f32.mrb[15].mxu1 }
 0x229   : > { %v1502_v61 = vmul.f32 %v1643_v14, %v1464_v36 }
 0x22a   : > { %v1518_v7 = vadd.f32 %v1644_v62, %v1503_v6 }
 0x22b   : > { %v1517_v40 = vadd.f32 %v1644_v62, %v1502_v61  ;;  %v1779_v9 = vpop.f32.mrb[16].mxu1 }
 0x22c   : > { %1526 = vst.msk [vmem:[%s496_s30 + $0x18] sm:$0xff] %vm1363_vm3, %v1518_v7  ;;  %v1505_v16 = vmul.f32 %v1779_v9, %v1643_v14  ;;  %v1474_v19 = vpop.f32.mrb[17].mxu1 }
 0x22d   : > { %1525 = vst.msk [vmem:[%s496_s30 + $0x10] sm:$0xff] %vm1363_vm3, %v1517_v40  ;;  %v1504_v55 = vmul.f32 %v1643_v14, %v1474_v19 }
 0x22e   : > { %v1520_v28 = vadd.f32 %v1644_v62, %v1505_v16 }
 0x22f   : > { %v1519_v54 = vadd.f32 %v1644_v62, %v1504_v55  ;;  %v1782_v15 = vpop.f32.mrb[18].mxu1 }
 0x230   : > { %1528 = vst.msk [vmem:[%s496_s30 + $0x28] sm:$0xff] %vm1363_vm3, %v1520_v28  ;;  %v1507_v56 = vmul.f32 %v1782_v15, %v1643_v14  ;;  %v1484_v30 = vpop.f32.mrb[19].mxu1 }
 0x231   : > { %1527 = vst.msk [vmem:[%s496_s30 + $0x20] sm:$0xff] %vm1363_vm3, %v1519_v54  ;;  %v1506_v26 = vmul.f32 %v1643_v14, %v1484_v30 }
 0x232   : > { %v1522_v44 = vadd.f32 %v1644_v62, %v1507_v56 }
 0x233   : > { %v1521_v21 = vadd.f32 %v1644_v62, %v1506_v26 }
 0x234   : > { %1530 = vst.msk [vmem:[%s496_s30 + $0x38] sm:$0xff] %vm1363_vm3, %v1522_v44 }
 0x235   : > { %1529 = vst.msk [vmem:[%s496_s30 + $0x30] sm:$0xff] %vm1363_vm3, %v1521_v21 }
 0x236 PF: > { %s25_s18 = sadd.s32 1, %s1825_s18  }
 0x237   : > { %p22_p5 = scmp.ge.s32.totalorder %s25_s18, 4  }
 0x239   :  { %24 = sbr.rel (!%p22_p5) target bundleno = 1 (0x1), region = 110 }

</bundles_post_ra>
